<compile_context>
chip_gen: v7x
topology: tpu7x:2x2x1
jax: 0.10.0
libtpu: 0.0.40
codegen_flags: <defaults>
</compile_context>

<pallas_src>
import functools

import jax
import jax.numpy as jnp
from jax.experimental import pallas as pl
from jax.experimental.pallas import tpu as pltpu


def pcnn_att_kernel(x_ref, m_ref, w_ref, b_ref, rw_ref, rb_ref, out_ref, *, ks):
    """One block of BLK instances: conv (im2col matmul) -> piecewise pool -> tanh -> scores."""
    blk, l_pad, c_in = x_ref.shape
    L = l_pad - (ks - 1)
    K = b_ref.shape[-1]

    # --- 'same' conv as ONE MXU matmul: in-VMEM im2col from static slices ----
    cols = jnp.concatenate([x_ref[:, t:t + L, :] for t in range(ks)], axis=-1)
    cols = cols.reshape(blk * L, ks * c_in)                     # (BLK*L, ks*C_in)
    acc = jnp.dot(cols, w_ref[...], preferred_element_type=jnp.float32)
    acc = acc.reshape(blk, L, K) + b_ref[...]                   # (BLK, L, K) f32

    # --- piecewise max pool (+100*mask trick), fused tanh + classifier -------
    mask100 = m_ref[...] * 100.0                                # (BLK, L, 3)
    pieces = [jnp.max(acc + mask100[:, :, p:p + 1], axis=1) - 100.0
              for p in range(3)]                                # 3 x (BLK, K)
    feat = jnp.tanh(jnp.concatenate(pieces, axis=-1))           # (BLK, 3K) p-major/k-minor
    out_ref[...] = (jnp.dot(feat, rw_ref[...],
                            preferred_element_type=jnp.float32)
                    + rb_ref[...])                              # (BLK, T_pad) lane-dense


def prep_params(conv_w, conv_b, rela_w, rela_b, *, conv_dtype=jnp.float32):
    """Torch-layout parameters -> kernel layouts (see module docstring)."""
    K, c_in, ks = conv_w.shape
    T = rela_w.shape[0]
    # conv (K, C_in, ks) -> (ks*C_in, K); row order t*C_in + c matches the im2col.
    conv_w_mat = jnp.transpose(conv_w, (2, 1, 0)).reshape(ks * c_in, K).astype(conv_dtype)
    conv_b_row = conv_b.reshape(1, K).astype(jnp.float32)
    # torch flattens pooled (K, 3) features k-major/p-minor (index 3*k + p); the
    # kernel concatenates pieces p-major/k-minor (index p*K + k), so permute the
    # weight rows to match and zero-pad tags to a full 128-lane register.
    t_pad = ((T + 127) // 128) * 128
    rela_w_pk = jnp.transpose(rela_w.reshape(T, K, 3), (2, 1, 0)).reshape(3 * K, T)
    rela_w_mat = jnp.pad(rela_w_pk, ((0, 0), (0, t_pad - T))).astype(jnp.float32)
    rela_b_row = jnp.pad(rela_b.reshape(1, T), ((0, 0), (0, t_pad - T))).astype(jnp.float32)
    return conv_w_mat, conv_b_row, rela_w_mat, rela_b_row


def pcnn_att_scores(x_pad, mask3, conv_w_mat, conv_b_row, rela_w_mat, rela_b_row,
                    *, ks, num_tags, block_insts=128):
    """Pre-softmax scores (N_inst, num_tags); argmax == PCNN_ATT decode preds.

    block_insts = instances per grid step.  Size it so the (BLK, l_pad, C_in)
    input tile is ~0.5-2 MB; keep BLK <= ~512 in f32 (~1024 in bf16) against
    v7x's 64 MiB VMEM (32 MiB default scoped) and v5e's 16 MiB scoped default.
    """
    n_inst, l_pad, c_in = x_pad.shape
    L = l_pad - (ks - 1)
    K = conv_b_row.shape[-1]
    t_pad = rela_w_mat.shape[-1]

    blk = min(block_insts, n_inst)
    blk = ((blk + 7) // 8) * 8                    # sublane-aligned instance tile
    n_padded = pl.cdiv(n_inst, blk) * blk
    if n_padded != n_inst:                        # pad instances to a whole tile
        x_pad = jnp.pad(x_pad, ((0, n_padded - n_inst), (0, 0), (0, 0)))
        mask3 = jnp.pad(mask3, ((0, n_padded - n_inst), (0, 0), (0, 0)))

    kern = functools.partial(pcnn_att_kernel, ks=ks)
    out = pl.pallas_call(
        kern,
        out_shape=jax.ShapeDtypeStruct((n_padded, t_pad), jnp.float32),
        grid=(n_padded // blk,),
        in_specs=[
            pl.BlockSpec((blk, l_pad, c_in), lambda i: (i, 0, 0)),
            pl.BlockSpec((blk, L, 3), lambda i: (i, 0, 0)),
            pl.BlockSpec((ks * c_in, K), lambda i: (0, 0)),
            pl.BlockSpec((1, K), lambda i: (0, 0)),
            pl.BlockSpec((3 * K, t_pad), lambda i: (0, 0)),
            pl.BlockSpec((1, t_pad), lambda i: (0, 0)),
        ],
        out_specs=pl.BlockSpec((blk, t_pad), lambda i: (i, 0)),
        compiler_params=pltpu.CompilerParams(
            dimension_semantics=("parallel",)),   # independent instance tiles (v7x: 2 TCs)
    )(x_pad, mask3, conv_w_mat, conv_b_row, rela_w_mat, rela_b_row)
    return out[:n_inst, :num_tags]


def reference_scores(x, mask3, conv_w, conv_b, rela_w, rela_b, *, ks):
    """Pure-JAX replica of PCNN_ATT.get_ins_feature + decode scores."""
    pad = ks // 2
    feats = jax.lax.conv_general_dilated(
        x.transpose(0, 2, 1), conv_w, window_strides=(1,),
        padding=((pad, pad),), dimension_numbers=("NCH", "OIH", "NCH"),
        precision=jax.lax.Precision.HIGHEST)
    feats = feats + conv_b[None, :, None]                 # (N, K, L)
    f = feats.transpose(0, 2, 1)[..., None]               # (N, L, K, 1)
    me = mask3[:, :, None, :] * 100.0                     # (N, L, 1, 3)
    pooled = jnp.max(f + me, axis=1) - 100.0              # (N, K, 3)
    n, K, _ = pooled.shape
    feat = jnp.tanh(pooled.reshape(n, K * 3))             # (N, 3K), k-major/p-minor
    return jnp.dot(feat, rela_w.T,
                   precision=jax.lax.Precision.HIGHEST) + rela_b


if __name__ == "__main__":
    # Module hyper-parameters (small, consistent with __init__).
    num_tags = 12
    vocab_size = 100
    embed_size = 32
    max_inp_len = 16
    pf_embed_size = 8
    conv_kernel_num = 32          # K
    conv_kernel_size = 3          # ks
    B, N_per_bag, L = 4, 4, 16    # 4 bags x 4 instances, seq length 16
    K, ks, T = conv_kernel_num, conv_kernel_size, num_tags
    C_in = embed_size + 2 * pf_embed_size

    key = jax.random.PRNGKey(0)
    ks_ = jax.random.split(key, 10)

    # Deterministic parameter init (shapes from PCNN_ATT.__init__).
    emb_w = 0.5 * jax.random.normal(ks_[0], (vocab_size, embed_size), jnp.float32)
    pos_w = 0.5 * jax.random.normal(ks_[1], (2 * max_inp_len, pf_embed_size), jnp.float32)
    mask_table = jnp.array([[0, 0, 0], [1, 0, 0], [0, 1, 0], [0, 0, 1]], jnp.float32)
    conv_w = jax.random.normal(ks_[2], (K, C_in, ks), jnp.float32) / (C_in * ks) ** 0.5
    conv_b = 0.1 * jax.random.normal(ks_[3], (K,), jnp.float32)
    rela_w = jax.random.normal(ks_[4], (T, 3 * K), jnp.float32)
    rela_b = jax.random.normal(ks_[5], (T,), jnp.float32)

    # Deterministic example inputs (already padded to common length L).
    context = jax.random.randint(ks_[6], (B, N_per_bag, L), 0, vocab_size)
    subj_dis = jax.random.randint(ks_[7], (B, N_per_bag, L), -max_inp_len, max_inp_len)
    obj_dis = jax.random.randint(ks_[8], (B, N_per_bag, L), -max_inp_len, max_inp_len)
    pool_mask = jax.random.randint(ks_[9], (B, N_per_bag, L), 1, 4)

    n_inst = B * N_per_bag

    # Glue: embedding lookups + concatenation (in_dropout/hid_dropout = identity at eval).
    emb = emb_w[context.reshape(n_inst, L)]                               # (Ni, L, E)
    pos_s = pos_w[(subj_dis + max_inp_len).reshape(n_inst, L)]            # (Ni, L, P)
    pos_o = pos_w[(obj_dis + max_inp_len).reshape(n_inst, L)]             # (Ni, L, P)
    x = jnp.concatenate([emb, pos_s, pos_o], axis=-1)                     # (Ni, L, C_in)
    pad = ks // 2
    x_pad = jnp.pad(x, ((0, 0), (pad, pad), (0, 0)))                      # (Ni, L+ks-1, C_in)
    mask3 = mask_table[pool_mask.reshape(n_inst, L)]                      # (Ni, L, 3)

    ref = reference_scores(x, mask3, conv_w, conv_b, rela_w, rela_b, ks=ks)
    preds_ref = jnp.argmax(ref, axis=-1).reshape(B, N_per_bag)

    # --- f32 path; block_insts=8 forces grid=(2,) to exercise instance tiling ---
    conv_w_mat, conv_b_row, rela_w_mat, rela_b_row = prep_params(
        conv_w, conv_b, rela_w, rela_b)
    scores = pcnn_att_scores(x_pad, mask3, conv_w_mat, conv_b_row,
                             rela_w_mat, rela_b_row,
                             ks=ks, num_tags=T, block_insts=8)
    scores = jax.block_until_ready(scores)
    assert jnp.allclose(scores, ref, atol=1e-2, rtol=1e-2), \
        f"f32 max abs diff {jnp.max(jnp.abs(scores - ref))}"
    preds = jnp.argmax(scores, axis=-1).reshape(B, N_per_bag)   # per-bag preds (decode=True)
    assert bool(jnp.all(preds == preds_ref))

    # --- bf16 input stream (v6e/v7x: halves HBM bytes of the dominant stream),
    #     f32 accumulation + f32 elementwise; default block_insts -> grid=(1,) ---
    conv_w_bf, conv_b_bf, rela_w_bf, rela_b_bf = prep_params(
        conv_w, conv_b, rela_w, rela_b, conv_dtype=jnp.bfloat16)
    scores_bf = pcnn_att_scores(x_pad.astype(jnp.bfloat16), mask3,
                                conv_w_bf, conv_b_bf, rela_w_bf, rela_b_bf,
                                ks=ks, num_tags=T)
    scores_bf = jax.block_until_ready(scores_bf)
    assert jnp.allclose(scores_bf, ref, atol=5e-2, rtol=5e-2), \
        f"bf16 max abs diff {jnp.max(jnp.abs(scores_bf - ref))}"

    print("KERNEL_OK")
</pallas_src>

<mosaic_0001>
module attributes {stable_mosaic.version = 11 : i64} {
  func.func @pcnn_att_kernel(%arg0: i32, %arg1: memref<8x18x48xf32, #tpu.memory_space<vmem>>, %arg2: memref<8x16x3xf32, #tpu.memory_space<vmem>>, %arg3: memref<144x32xf32, #tpu.memory_space<vmem>>, %arg4: memref<1x32xf32, #tpu.memory_space<vmem>>, %arg5: memref<96x128xf32, #tpu.memory_space<vmem>>, %arg6: memref<1x128xf32, #tpu.memory_space<vmem>>, %arg7: memref<8x128xf32, #tpu.memory_space<vmem>>) attributes {dimension_semantics = [#tpu.dimension_semantics<parallel>], iteration_bounds = array<i64: 2>, scalar_prefetch = 0 : i64, scratch_operands = 0 : i64, tpu.core_type = #tpu.core_type<tc>, window_params = [{transform_indices = @transform_0, window_bounds = array<i64: 8, 18, 48>}, {transform_indices = @transform_1, window_bounds = array<i64: 8, 16, 3>}, {pipeline_mode = #tpu.pipeline_mode<synchronous>, transform_indices = @transform_2, window_bounds = array<i64: 144, 32>}, {pipeline_mode = #tpu.pipeline_mode<synchronous>, transform_indices = @transform_3, window_bounds = array<i64: 1, 32>}, {pipeline_mode = #tpu.pipeline_mode<synchronous>, transform_indices = @transform_4, window_bounds = array<i64: 96, 128>}, {pipeline_mode = #tpu.pipeline_mode<synchronous>, transform_indices = @transform_5, window_bounds = array<i64: 1, 128>}, {transform_indices = @transform_6, window_bounds = array<i64: 8, 128>}]} {
    %c0 = arith.constant 0 : index
    %c0_0 = arith.constant 0 : index
    %c0_1 = arith.constant 0 : index
    %0 = vector.load %arg1[%c0, %c0_0, %c0_1] : memref<8x18x48xf32, #tpu.memory_space<vmem>>, vector<8x16x48xf32>
    %c0_2 = arith.constant 0 : index
    %c1 = arith.constant 1 : index
    %c0_3 = arith.constant 0 : index
    %1 = vector.load %arg1[%c0_2, %c1, %c0_3] : memref<8x18x48xf32, #tpu.memory_space<vmem>>, vector<8x16x48xf32>
    %c0_4 = arith.constant 0 : index
    %c2 = arith.constant 2 : index
    %c0_5 = arith.constant 0 : index
    %2 = vector.load %arg1[%c0_4, %c2, %c0_5] : memref<8x18x48xf32, #tpu.memory_space<vmem>>, vector<8x16x48xf32>
    %3 = tpu.concatenate %0, %1, %2 in 2 : vector<8x16x48xf32>, vector<8x16x48xf32>, vector<8x16x48xf32> -> vector<8x16x144xf32>
    %4 = vector.shape_cast %3 : vector<8x16x144xf32> to vector<128x144xf32>
    %c0_6 = arith.constant 0 : index
    %c0_7 = arith.constant 0 : index
    %5 = vector.load %arg3[%c0_6, %c0_7] : memref<144x32xf32, #tpu.memory_space<vmem>>, vector<144x32xf32>
    %cst = arith.constant dense<0.000000e+00> : vector<128x32xf32>
    %6 = tpu.matmul %4, %5, %cst {dimension_numbers = #tpu.dot_dimension_numbers<[1], [0], [0], [1], [0, 0, 1, 1], [], []>} : vector<128x144xf32>, vector<144x32xf32>, vector<128x32xf32> -> vector<128x32xf32>
    %7 = vector.shape_cast %6 : vector<128x32xf32> to vector<8x16x32xf32>
    %c0_8 = arith.constant 0 : index
    %c0_9 = arith.constant 0 : index
    %8 = vector.load %arg4[%c0_8, %c0_9] : memref<1x32xf32, #tpu.memory_space<vmem>>, vector<1x32xf32>
    %9 = vector.shape_cast %8 : vector<1x32xf32> to vector<1x1x32xf32>
    %10 = vector.broadcast %9 : vector<1x1x32xf32> to vector<8x16x32xf32>
    %11 = arith.addf %7, %10 : vector<8x16x32xf32>
    %c0_10 = arith.constant 0 : index
    %c0_11 = arith.constant 0 : index
    %c0_12 = arith.constant 0 : index
    %12 = vector.load %arg2[%c0_10, %c0_11, %c0_12] : memref<8x16x3xf32, #tpu.memory_space<vmem>>, vector<8x16x3xf32>
    %cst_13 = arith.constant 1.000000e+02 : f32
    %13 = vector.broadcast %cst_13 : f32 to vector<8x16x3xf32>
    %14 = arith.mulf %12, %13 : vector<8x16x3xf32>
    %15 = vector.extract_strided_slice %14 {offsets = [0, 0, 0], sizes = [8, 16, 1], strides = [1, 1, 1]} : vector<8x16x3xf32> to vector<8x16x1xf32>
    %16 = vector.broadcast %15 : vector<8x16x1xf32> to vector<8x16x32xf32>
    %17 = arith.addf %11, %16 : vector<8x16x32xf32>
    %cst_14 = arith.constant dense<0xFF800000> : vector<8x32xf32>
    %18 = vector.multi_reduction <maximumf>, %17, %cst_14 [1] : vector<8x16x32xf32> to vector<8x32xf32>
    %cst_15 = arith.constant 1.000000e+02 : f32
    %19 = vector.broadcast %cst_15 : f32 to vector<8x32xf32>
    %20 = arith.subf %18, %19 : vector<8x32xf32>
    %21 = vector.extract_strided_slice %14 {offsets = [0, 0, 1], sizes = [8, 16, 1], strides = [1, 1, 1]} : vector<8x16x3xf32> to vector<8x16x1xf32>
    %22 = vector.broadcast %21 : vector<8x16x1xf32> to vector<8x16x32xf32>
    %23 = arith.addf %11, %22 : vector<8x16x32xf32>
    %cst_16 = arith.constant dense<0xFF800000> : vector<8x32xf32>
    %24 = vector.multi_reduction <maximumf>, %23, %cst_16 [1] : vector<8x16x32xf32> to vector<8x32xf32>
    %cst_17 = arith.constant 1.000000e+02 : f32
    %25 = vector.broadcast %cst_17 : f32 to vector<8x32xf32>
    %26 = arith.subf %24, %25 : vector<8x32xf32>
    %27 = vector.extract_strided_slice %14 {offsets = [0, 0, 2], sizes = [8, 16, 1], strides = [1, 1, 1]} : vector<8x16x3xf32> to vector<8x16x1xf32>
    %28 = vector.broadcast %27 : vector<8x16x1xf32> to vector<8x16x32xf32>
    %29 = arith.addf %11, %28 : vector<8x16x32xf32>
    %cst_18 = arith.constant dense<0xFF800000> : vector<8x32xf32>
    %30 = vector.multi_reduction <maximumf>, %29, %cst_18 [1] : vector<8x16x32xf32> to vector<8x32xf32>
    %cst_19 = arith.constant 1.000000e+02 : f32
    %31 = vector.broadcast %cst_19 : f32 to vector<8x32xf32>
    %32 = arith.subf %30, %31 : vector<8x32xf32>
    %33 = tpu.concatenate %20, %26, %32 in 1 : vector<8x32xf32>, vector<8x32xf32>, vector<8x32xf32> -> vector<8x96xf32>
    %34 = math.tanh %33 : vector<8x96xf32>
    %c0_20 = arith.constant 0 : index
    %c0_21 = arith.constant 0 : index
    %35 = vector.load %arg5[%c0_20, %c0_21] : memref<96x128xf32, #tpu.memory_space<vmem>>, vector<96x128xf32>
    %cst_22 = arith.constant dense<0.000000e+00> : vector<8x128xf32>
    %36 = tpu.matmul %34, %35, %cst_22 {dimension_numbers = #tpu.dot_dimension_numbers<[1], [0], [0], [1], [0, 0, 1, 1], [], []>} : vector<8x96xf32>, vector<96x128xf32>, vector<8x128xf32> -> vector<8x128xf32>
    %c0_23 = arith.constant 0 : index
    %c0_24 = arith.constant 0 : index
    %37 = vector.load %arg6[%c0_23, %c0_24] : memref<1x128xf32, #tpu.memory_space<vmem>>, vector<1x128xf32>
    %38 = vector.broadcast %37 : vector<1x128xf32> to vector<8x128xf32>
    %39 = arith.addf %36, %38 : vector<8x128xf32>
    %c0_25 = arith.constant 0 : index
    %c0_26 = arith.constant 0 : index
    %40 = vector.load %arg7[%c0_25, %c0_26] : memref<8x128xf32, #tpu.memory_space<vmem>>, vector<8x128xf32>
    tpu.vector_store %arg7[%c0_25, %c0_26], %39 {strides = array<i32>} : memref<8x128xf32, #tpu.memory_space<vmem>>, vector<8x128xf32>,
    return
  }
  func.func @transform_0(%arg0: i32) -> (i32, i32, i32) {
    %c0_i32 = arith.constant 0 : i32
    %c0_i32_0 = arith.constant 0 : i32
    %c0_i32_1 = arith.constant 0 : i32
    return %arg0, %c0_i32, %c0_i32_0 : i32, i32, i32
  }
  func.func @transform_1(%arg0: i32) -> (i32, i32, i32) {
    %c0_i32 = arith.constant 0 : i32
    %c0_i32_0 = arith.constant 0 : i32
    %c0_i32_1 = arith.constant 0 : i32
    return %arg0, %c0_i32, %c0_i32_0 : i32, i32, i32
  }
  func.func @transform_2(%arg0: i32) -> (i32, i32) {
    %c0_i32 = arith.constant 0 : i32
    %c0_i32_0 = arith.constant 0 : i32
    %c0_i32_1 = arith.constant 0 : i32
    return %c0_i32, %c0_i32_0 : i32, i32
  }
  func.func @transform_3(%arg0: i32) -> (i32, i32) {
    %c0_i32 = arith.constant 0 : i32
    %c0_i32_0 = arith.constant 0 : i32
    %c0_i32_1 = arith.constant 0 : i32
    return %c0_i32, %c0_i32_0 : i32, i32
  }
  func.func @transform_4(%arg0: i32) -> (i32, i32) {
    %c0_i32 = arith.constant 0 : i32
    %c0_i32_0 = arith.constant 0 : i32
    %c0_i32_1 = arith.constant 0 : i32
    return %c0_i32, %c0_i32_0 : i32, i32
  }
  func.func @transform_5(%arg0: i32) -> (i32, i32) {
    %c0_i32 = arith.constant 0 : i32
    %c0_i32_0 = arith.constant 0 : i32
    %c0_i32_1 = arith.constant 0 : i32
    return %c0_i32, %c0_i32_0 : i32, i32
  }
  func.func @transform_6(%arg0: i32) -> (i32, i32) {
    %c0_i32 = arith.constant 0 : i32
    %c0_i32_0 = arith.constant 0 : i32
    return %arg0, %c0_i32 : i32, i32
  }
}

</mosaic_0001>

<bundles_post_ra>
// kernel: tpu_custom_call.1
= control target key start
LH: loop header
LB: loop body
LE: loop exit
PB: predicated region body
PF: predicated region fallthrough
CT: control target
= control target key end

     0   :  { %11 = vsyncpa [#allocation3], 0  ;;  %s2555_s0 = inlined_call_operand.vmem [shape: f32[16,18,48], index: 0, kind: input, shape index: {}]   ;;  %s2556_s1 = inlined_call_operand.vmem [shape: f32[16,16,3], index: 1, kind: input, shape index: {}]   ;;  %s2557_s2 = inlined_call_operand.vmem [shape: f32[144,32], index: 2, kind: input, shape index: {}]   ;;  %s2558_s3 = inlined_call_operand.vmem [shape: f32[1,32], index: 3, kind: input, shape index: {}]   ;;  %s2559_s4 = inlined_call_operand.vmem [shape: f32[96,128], index: 4, kind: input, shape index: {}]   ;;  %s2560_s5 = inlined_call_operand.vmem [shape: f32[1,128], index: 5, kind: input, shape index: {}]   ;;  %s2561_s6 = inlined_call_operand.hbm [shape: f32[16,128], index: 6, kind: output, shape index: {}]  }
   0x1   :  { %13 = vsyncpa [#allocation3 + $0x1], 0  ;;  %s1854_s21 = smov 0   ;;  %s1856_s22 = smov 0  }
   0x2   :  { %s1858_s23 = smov 0   ;;  %s1860_s24 = smov 0  }
   0x3 LB: > { %s1875_s25 = sadd.s32 4294967295, %s1806_s24   ;;  %s1479_s26 = sadd.s32 4294967294, %s1806_s24   ;;  %s1806_s24 = sphi %s1860_s24, %s2567_s24   ;;  %s1802_s23 = sphi %s1858_s23, %s2566_s23   ;;  %s1798_s22 = sphi %s1856_s22, %s2565_s22   ;;  %s1794_s21 = sphi %s1854_s21, %s2564_s21  }
   0x4   : > { %s1879_s27 = sadd.s32 1, %s1806_s24   ;;  %s162_s28 = sadd.s32 1, %s1802_s23 }
   0x5   : > { %s159_s29 = ssub.s32 %s1806_s24, %s1879_s27  ;;  %p172_p0 = scmp.ne.s32.totalorder %s1802_s23, %s1798_s22 }
   0x6   : > { %p160_p1 = scmp.eq.s32.totalorder %s159_s29, 0  ;;  %p173_p2 = scmp.eq.s32.totalorder %s1875_s25, 1 }
   0x7   : > { %p178_p3 = scmp.ne.s32.totalorder %s1798_s22, %s1794_s21  ;;  %p179_p4 = scmp.eq.s32.totalorder %s1479_s26, 1 }
   0x8   : > { %s1890_s30 = scalar_select %p160_p1, %s1802_s23, %s162_s28  }
   0x9   : > { %p1892_p5 = por %p173_p2, %p172_p0  ;;  %p1896_p6 = por %p179_p4, %p178_p3 }
   0xa   : > { %p1482_p7 = scmp.ge.s32.totalorder %s1806_s24, 1  ;;  %p229_p8 = scmp.lt.s32.totalorder %s1806_s24, 3 }
   0xc   : > { %p230_p9 = pnand %p1482_p7, %p229_p8 }
   0xd   : > { %s1484_s9 = sshll.u32 (!%p230_p9), %s1875_s25, 3  ;;  %v490_v0 = vld [vmem:[%s2557_s2] sm:$0xff] (!%p230_p9)  ;;  %v491_v1 = vld [vmem:[%s2557_s2 + $0x8] sm:$0xff] (!%p230_p9)  ;;  %v492_v2 = vld [vmem:[%s2557_s2 + $0x10] sm:$0xff] (!%p230_p9)  ;;  %v1808_v3 = vmov (!%p230_p9), 0.0|0.0   ;;  %v1809_v6 = vmov (!%p230_p9), 1  }
   0xe   : > { %233 = sbr.rel (%p230_p9) target bundleno = 805 (0x325), region = 44  ;;  %p267_p10 = scmp.lt.s32.totalorder (!%p230_p9), %s1484_s9, 15  ;;  %1577 = vmatprep.subr.bf16.mxu0 (!%p230_p9), %v1808_v3  ;;  %v1578_v4 = vpack.c.bf16 (!%p230_p9), %v491_v1, %v490_v0  ;;  %v493_v5 = vld [vmem:[%s2557_s2 + $0x18] sm:$0xff] (!%p230_p9)  ;;  %1622 = vmatprep.subr.bf16.mxu1 (!%p230_p9), %v1808_v3  ;;  %v494_v8 = vld [vmem:[%s2557_s2 + $0x20] sm:$0xff] (!%p230_p9)  ;;  %v495_v9 = vld [vmem:[%s2557_s2 + $0x28] sm:$0xff] (!%p230_p9)  ;;  %vm456_vm0 = vcmask (!%p230_p9), 392192  }
   0xf   : > { %1725 = vset.pattern.permute.xlu1 (!%p230_p9), %v1809_v6  ;;  %1726 = vset.pattern.permute.xlu0 (!%p230_p9), %v1809_v6  ;;  %v1581_v7 = vpack.c.bf16 (!%p230_p9), %v493_v5, %v492_v2  ;;  %v1584_v10 = vpack.c.bf16 (!%p230_p9), %v495_v9, %v494_v8  ;;  %v496_v11 = vld [vmem:[%s2557_s2 + $0x30] sm:$0xff] (!%p230_p9)  ;;  %v497_v12 = vld [vmem:[%s2557_s2 + $0x38] sm:$0xff] (!%p230_p9)  ;;  %s1810_s16 = smov (!%p230_p9), 96   ;;  %s1811_s17 = smov (!%p230_p9), 48   ;;  %v498_v24 = vld [vmem:[%s2557_s2 + $0x40] sm:$0xff] (!%p230_p9)  ;;  %vm508_vm1 = vcmask (!%p230_p9), 130048  }
  0x10   : > { %1579 = vmatpush1.bf16.msra.mxu0 (!%p230_p9), %v1578_v4  ;;  %1631 = vmatpush1.bf16.msra.mxu1 (!%p230_p9), %v1578_v4  ;;  %v1587_v22 = vpack.c.bf16 (!%p230_p9), %v497_v12, %v496_v11  ;;  %v499_v25 = vld [vmem:[%s2557_s2 + $0x48] sm:$0xff] (!%p230_p9)  ;;  %v500_v29 = vld [vmem:[%s2557_s2 + $0x50] sm:$0xff] (!%p230_p9)  ;;  %v501_v30 = vld [vmem:[%s2557_s2 + $0x58] sm:$0xff] (!%p230_p9)  ;;  %vm473_vm2 = vcmask (!%p230_p9), 785408   ;;  %vm837_vm3 = vcmask (!%p230_p9), 261120   ;;  %vm1246_vm4 = vcmask (!%p230_p9), 1041409  }
  0x11   : > { %1580 = vmatprep.subr.bf16.mxu0 (!%p230_p9), %v1808_v3  ;;  %1623 = vmatprep.subr.bf16.mxu1 (!%p230_p9), %v1808_v3  ;;  %v1590_v27 = vpack.c.bf16 (!%p230_p9), %v499_v25, %v498_v24  ;;  %v1593_v32 = vpack.c.bf16 (!%p230_p9), %v501_v30, %v500_v29  ;;  %v502_v33 = vld [vmem:[%s2557_s2 + $0x60] sm:$0xff] (!%p230_p9)  ;;  %v503_v34 = vld [vmem:[%s2557_s2 + $0x68] sm:$0xff] (!%p230_p9)  ;;  %v504_v43 = vld [vmem:[%s2557_s2 + $0x70] sm:$0xff] (!%p230_p9)  ;;  %vm1248_vm5 = vcmask (!%p230_p9), 1042434   ;;  %vm1250_vm6 = vcmask (!%p230_p9), 1043459   ;;  %s1815_s15 = smov (!%p230_p9), 32  }
  0x12   : > { %v1596_v42 = vpack.c.bf16 (!%p230_p9), %v503_v34, %v502_v33  ;;  %v505_v44 = vld [vmem:[%s2557_s2 + $0x78] sm:$0xff] (!%p230_p9)  ;;  %v506_v48 = vld [vmem:[%s2557_s2 + $0x80] sm:$0xff] (!%p230_p9)  ;;  %v507_v49 = vld [vmem:[%s2557_s2 + $0x88] sm:$0xff] (!%p230_p9)  ;;  %vm1252_vm7 = vcmask (!%p230_p9), 1044484   ;;  %vm1254_vm8 = vcmask (!%p230_p9), 1045509   ;;  %vm1256_vm9 = vcmask (!%p230_p9), 1046534  }
  0x13   : > { %v1599_v46 = vpack.c.bf16 (!%p230_p9), %v505_v44, %v504_v43  ;;  %v1602_v51 = vpack.c.bf16 (!%p230_p9), %v507_v49, %v506_v48  ;;  %vm1258_vm10 = vcmask (!%p230_p9), 1047559   ;;  %vm1816_vm11 = vmmov (!%p230_p9), 0   ;;  %s263_s18 = sand.u32 (!%p230_p9), 1, %s1798_s22  }
  0x14   : > { %1582 = vmatpush1.bf16.msra.mxu0 (!%p230_p9), %v1581_v7  ;;  %1632 = vmatpush1.bf16.msra.mxu1 (!%p230_p9), %v1581_v7  ;;  %vm1298_vm12 = vcmask (!%p230_p9), 523264   ;;  %s1395_s10 = scalar_lea.sflag (!%p230_p9), [#allocation3], %s263_s18 }
  0x15   : > { %s2569_s9 = smov (!%p267_p10, %s1484_s9), 15  ;;  %1583 = vmatprep.subr.bf16.mxu0 %v1808_v3  ;;  %1624 = vmatprep.subr.bf16.mxu1 %v1808_v3 }
  0x16   : > { %s1640_s28 = smul.u32 24, %s2569_s9  ;;  %s1536_s14 = sshll.u32 %s2569_s9, 4 }
  0x17   : > { %s2038_s19 = scalar_lea.vmem %s2556_s1, %s1536_s14  ;;  %s1814_s14 = smov 64  }
  0x18   : > { %s1933_s11 = scalar_lea.vmem %s2555_s0, %s1640_s28  ;;  %1585 = vmatpush1.bf16.msra.mxu0 %v1584_v10  ;;  %1633 = vmatpush1.bf16.msra.mxu1 %v1584_v10  ;;  %v709_v2 = vld [vmem:[%s2038_s19] sm:$0xff]  ;;  %v711_v7 = vld [vmem:[%s2038_s19 + $0x10] sm:$0xff]  ;;  %v712_v10 = vld [vmem:[%s2038_s19 + $0x18] sm:$0xff] }
  0x19   : > { %v313_v13 = vld [vmem:[%s1933_s11 + $0xa] sm:$0xff]  ;;  %v296_v14 = vld [vmem:[%s1933_s11 + $0x1] sm:$0xff]  ;;  %v298_v17 = vld [vmem:[%s1933_s11 + $0x19] sm:$0xff]  ;;  %1586 = vmatprep.subr.bf16.mxu0 %v1808_v3  ;;  %1625 = vmatprep.subr.bf16.mxu1 %v1808_v3  ;;  %v2047_v5 = vmul.f32 100.0, %v709_v2  ;;  %v2053_v9 = vmul.f32 100.0, %v711_v7  ;;  %v2059_v12 = vmul.f32 100.0, %v712_v10 }
  0x1a   : > { %v297_v15 = vld [vmem:[%s1933_s11 + $0x9] sm:$0xff]  ;;  %410 = vrot.lane.b32.xlu1 %v313_v13, %s1810_s16  ;;  %v299_v20 = vld [vmem:[%s1933_s11 + $0x21] sm:$0xff]  ;;  %v306_v21 = vld [vmem:[%s1933_s11 + $0x79] sm:$0xff] }
  0x1b   : > { %v1690_v16 = vpack.i.bf16 %v297_v15, %v296_v14  ;;  %v305_v18 = vld [vmem:[%s1933_s11 + $0x69] sm:$0xff]  ;;  %v1700_v26 = vpack.i.bf16 %v306_v21, %v299_v20  ;;  %v314_v28 = vld [vmem:[%s1933_s11 + $0x1a] sm:$0xff]  ;;  %v300_v36 = vld [vmem:[%s1933_s11 + $0x31] sm:$0xff] }
  0x1c   : > { %v1695_v19 = vpack.i.bf16 %v305_v18, %v298_v17  ;;  %v312_v23 = vld [vmem:[%s1933_s11 + $0x2] sm:$0xff]  ;;  %1588 = vmatpush1.bf16.msra.mxu0 %v1587_v22  ;;  %1634 = vmatpush1.bf16.msra.mxu1 %v1587_v22  ;;  %v321_v35 = vld [vmem:[%s1933_s11 + $0x6a] sm:$0xff]  ;;  %v322_v38 = vld [vmem:[%s1933_s11 + $0x7a] sm:$0xff]  ;;  %v1812_v22 = vmov 2  }
  0x1d   : > { %1691 = vrot.lane.b32.xlu0 %v1690_v16, %s1811_s17  ;;  %1589 = vmatprep.subr.bf16.mxu0 %v1808_v3  ;;  %v315_v31 = vld [vmem:[%s1933_s11 + $0x22] sm:$0xff]  ;;  %v301_v39 = vld [vmem:[%s1933_s11 + $0x39] sm:$0xff]  ;;  %v308_v40 = vld [vmem:[%s1933_s11 + $0x91] sm:$0xff] }
  0x1e   : > { %1696 = vrot.lane.b32.xlu1 %v1695_v19, %s1811_s17  ;;  %1626 = vmatprep.subr.bf16.mxu1 %v1808_v3  ;;  %v307_v37 = vld [vmem:[%s1933_s11 + $0x81] sm:$0xff]  ;;  %v1710_v45 = vpack.i.bf16 %v308_v40, %v301_v39  ;;  %v316_v47 = vld [vmem:[%s1933_s11 + $0x32] sm:$0xff]  ;;  %v302_v53 = vld [vmem:[%s1933_s11 + $0x49] sm:$0xff] }
  0x1f   : > { %v1705_v41 = vpack.i.bf16 %v307_v37, %v300_v36  ;;  %v317_v50 = vld [vmem:[%s1933_s11 + $0x3a] sm:$0xff]  ;;  %v323_v52 = vld [vmem:[%s1933_s11 + $0x82] sm:$0xff]  ;;  %v324_v55 = vld [vmem:[%s1933_s11 + $0x92] sm:$0xff]  ;;  %v1813_v37 = vmov 0  }
  0x20   : > { %1591 = vmatpush1.bf16.msra.mxu0 %v1590_v27  ;;  %1635 = vmatpush1.bf16.msra.mxu1 %v1590_v27  ;;  %v309_v54 = vld [vmem:[%s1933_s11 + $0x99] sm:$0xff]  ;;  %v303_v56 = vld [vmem:[%s1933_s11 + $0x51] sm:$0xff]  ;;  %v310_v57 = vld [vmem:[%s1933_s11 + $0xa9] sm:$0xff] }
  0x21   : > { %408 = vrot.lane.b32.xlu0 %v312_v23, %s1810_s16  ;;  %1592 = vmatprep.subr.bf16.mxu0 %v1808_v3  ;;  %v1715_v58 = vpack.i.bf16 %v309_v54, %v302_v53  ;;  %v1720_v59 = vpack.i.bf16 %v310_v57, %v303_v56  ;;  %v318_v60 = vld [vmem:[%s1933_s11 + $0x4a] sm:$0xff]  ;;  %v319_v61 = vld [vmem:[%s1933_s11 + $0x52] sm:$0xff]  ;;  %v325_v62 = vld [vmem:[%s1933_s11 + $0x9a] sm:$0xff] }
  0x22   : > { %1701 = vrot.lane.b32.xlu1 %v1700_v26, %s1811_s17  ;;  %1627 = vmatprep.subr.bf16.mxu1 %v1808_v3  ;;  %v326_v63 = vld [vmem:[%s1933_s11 + $0xaa] sm:$0xff]  ;;  %v304_v0 = vld [vmem:[%s1933_s11 + $0x61] sm:$0xff]  ;;  %v327_v8 = vld [vmem:[%s1933_s11 + $0xb2] sm:$0xff] }
  0x23   : > { %v311_v1 = vld [vmem:[%s1933_s11 + $0xb1] sm:$0xff]  ;;  %v320_v4 = vld [vmem:[%s1933_s11 + $0x62] sm:$0xff] }
  0x24   : > { %1594 = vmatpush1.bf16.msra.mxu0 %v1593_v32  ;;  %1636 = vmatpush1.bf16.msra.mxu1 %v1593_v32  ;;  %v710_v11 = vld [vmem:[%s2038_s19 + $0x8] sm:$0xff]  ;;  %v713_v15 = vld [vmem:[%s2038_s19 + $0x20] sm:$0xff]  ;;  %v716_v18 = vld [vmem:[%s2038_s19 + $0x38] sm:$0xff] }
  0x25   : > { %412 = vrot.lane.b32.xlu0 %v314_v28, %s1810_s16  ;;  %1595 = vmatprep.subr.bf16.mxu0 %v1808_v3  ;;  %v726_v13 = vmul.f32 100.0, %v710_v11  ;;  %v714_v14 = vld [vmem:[%s2038_s19 + $0x28] sm:$0xff]  ;;  %v729_v17 = vmul.f32 100.0, %v713_v15  ;;  %v2068_v19 = vmul.f32 100.0, %v716_v18  ;;  %v717_v20 = vld [vmem:[%s2038_s19 + $0x40] sm:$0xff]  ;;  %v720_v21 = vld [vmem:[%s2038_s19 + $0x58] sm:$0xff] }
  0x26   : > { %414 = vrot.lane.b32.xlu1 %v315_v31, %s1810_s16  ;;  %1628 = vmatprep.subr.bf16.mxu1 %v1808_v3  ;;  %v2064_v16 = vmul.f32 100.0, %v714_v14  ;;  %v733_v23 = vmul.f32 100.0, %v717_v20  ;;  %v2074_v24 = vmul.f32 100.0, %v720_v21  ;;  %v715_v25 = vld [vmem:[%s2038_s19 + $0x30] sm:$0xff]  ;;  %v721_v26 = vld [vmem:[%s2038_s19 + $0x60] sm:$0xff]  ;;  %v724_v29 = vld [vmem:[%s2038_s19 + $0x78] sm:$0xff] }
  0x27   : > { %v731_v27 = vmul.f32 100.0, %v715_v25  ;;  %v2080_v28 = vmul.f32 100.0, %v721_v26  ;;  %v2085_v30 = vmul.f32 100.0, %v724_v29  ;;  %v718_v31 = vld [vmem:[%s2038_s19 + $0x48] sm:$0xff]  ;;  %v719_v33 = vld [vmem:[%s2038_s19 + $0x50] sm:$0xff]  ;;  %v282_v53 = vld [vmem:[%s1933_s11 + $0x18] sm:$0xff] }
  0x28   : > { %1597 = vmatpush1.bf16.msra.mxu0 %v1596_v42  ;;  %1637 = vmatpush1.bf16.msra.mxu1 %v1596_v42  ;;  %v2093_v32 = vmul.f32 100.0, %v718_v31  ;;  %v735_v34 = vmul.f32 100.0, %v719_v33  ;;  %v280_v42 = vld [vmem:[%s1933_s11] sm:$0xff]  ;;  %v289_v57 = vld [vmem:[%s1933_s11 + $0x68] sm:$0xff]  ;;  %v284_v11 = vld [vmem:[%s1933_s11 + $0x30] sm:$0xff] }
  0x29   : > { %426 = vrot.lane.b32.xlu0 %v321_v35, %s1810_s16  ;;  %1598 = vmatprep.subr.bf16.mxu0 %v1808_v3  ;;  %v723_v35 = vld [vmem:[%s2038_s19 + $0x70] sm:$0xff]  ;;  %v285_v18 = vld [vmem:[%s1933_s11 + $0x38] sm:$0xff] }
  0x2a   : > { %428 = vrot.lane.b32.xlu1 %v322_v38, %s1810_s16  ;;  %1629 = vmatprep.subr.bf16.mxu1 %v1808_v3  ;;  %v739_v36 = vmul.f32 100.0, %v723_v35  ;;  %v722_v38 = vld [vmem:[%s2038_s19 + $0x68] sm:$0xff]  ;;  %v292_v33 = vld [vmem:[%s1933_s11 + $0x90] sm:$0xff]  ;;  %s1483_s19 = sshll.u32 %s263_s18, 3 }
  0x2b   : > { %v2107_v39 = vmul.f32 100.0, %v722_v38 }
  0x2c   : > { %1600 = vmatpush1.bf16.msra.mxu0 %v1599_v46  ;;  %1638 = vmatpush1.bf16.msra.mxu1 %v1599_v46 }
  0x2d   : > { %1706 = vrot.lane.b32.xlu0 %v1705_v41, %s1811_s17  ;;  %1601 = vmatprep.subr.bf16.mxu0 %v1808_v3 }
  0x2e   : > { %1711 = vrot.lane.b32.xlu1 %v1710_v45, %s1811_s17  ;;  %1630 = vmatprep.subr.bf16.mxu1 %v1808_v3 }
  0x30   : > { %1603 = vmatpush1.bf16.msra.mxu0 %v1602_v51  ;;  %1639 = vmatpush1.bf16.msra.mxu1 %v1602_v51 }
  0x31   : > { %416 = vrot.lane.b32.xlu0 %v316_v47, %s1810_s16  ;;  %1604 = vmatprep.subr.bf16.mxu1 %v1808_v3  ;;  %v281_v47 = vld [vmem:[%s1933_s11 + $0x8] sm:$0xff] }
  0x32   : > { %418 = vrot.lane.b32.xlu1 %v317_v50, %s1810_s16 }
  0x35   : > { %430 = vrot.lane.b32.xlu0 %v323_v52, %s1810_s16 }
  0x36   : > { %432 = vrot.lane.b32.xlu1 %v324_v55, %s1810_s16 }
  0x39   : > { %1716 = vrot.lane.b32.xlu0 %v1715_v58, %s1811_s17 }
  0x3a   : > { %1721 = vrot.lane.b32.xlu1 %v1720_v59, %s1811_s17 }
  0x3d   : > { %420 = vrot.lane.b32.xlu0 %v318_v60, %s1810_s16 }
  0x3e   : > { %422 = vrot.lane.b32.xlu1 %v319_v61, %s1810_s16  ;;  %v283_v61 = vld [vmem:[%s1933_s11 + $0x20] sm:$0xff] }
  0x41   : > { %434 = vrot.lane.b32.xlu0 %v325_v62, %s1810_s16  ;;  %v290_v62 = vld [vmem:[%s1933_s11 + $0x78] sm:$0xff] }
  0x42   : > { %436 = vrot.lane.b32.xlu1 %v326_v63, %s1810_s16 }
  0x45   : > { %360 = vrot.lane.b32.xlu0 %v304_v0, %s1811_s17 }
  0x46   : > { %374 = vrot.lane.b32.xlu1 %v311_v1, %s1811_s17  ;;  %s265_s17 = scalar_lea.vmem [#allocation2], %s1483_s19 }
  0x47   : > { %s1408_s20 = sshll.u32 %s265_s17, 4  ;;  %s2515_s20 = int_to_ptr.vmem [resolvable:$true] %s1408_s20 }
  0x48   : > { %s1744_s12 = scalar_lea.vmem %s2515_s20, 128 }
  0x49   : > { %424 = vrot.lane.b32.xlu0 %v320_v4, %s1810_s16  ;;  %p1745_p11 = scmp.ne.s32.totalorder %s2515_s20, %s1744_s12 }
  0x4a   : > { %919 = vperm.xlu1 %1725, %v2047_v5  }
  0x4b   : > { %p1746_p12 = pnand %p1745_p11, %p1892_p5 }
  0x4d   : > { %438 = vrot.lane.b32.xlu0 %v327_v8, %s1810_s16  ;;  %s1533_s16 = sshll.u32 %s1875_s25, 7  ;;  %p1747_p13 = pneg %p1746_p12 }
  0x4e   : > { %927 = vperm.xlu1 %1725, %v2053_v9   ;;  %s2513_s29 = scalar_lea.hbm %s2561_s6, %s1533_s16  ;;  %s1818_s25 = smov [#allocation2]  }
  0x4f   : > { %s1748_s13 = sshll.u32 %s1818_s25, 4  ;;  %s1749_s13 = int_to_ptr.vmem [resolvable:$false] %s1748_s13 }
  0x50   : > { %p1751_p0 = scmp.lt.s32.totalorder %s2515_s20, %s1749_s13 }
  0x51   : > { %923 = vperm.xlu0 %1726, %v726_v13  }
  0x52   : > { %931 = vperm.xlu1 %1725, %v2059_v12  }
  0x55   : > { %935 = vperm.xlu0 %1726, %v729_v17  }
  0x56   : > { %939 = vperm.xlu1 %1725, %v2064_v16  }
  0x59   : > { %947 = vperm.xlu0 %1726, %v2068_v19  }
  0x5a   : > { %1727 = vset.pattern.permute.xlu1 %v1812_v22 }
  0x5b   : > { %1083 = vperm.xlu1 %1727, %v726_v13  }
  0x5d   : > { %951 = vperm.xlu0 %1726, %v733_v23  }
  0x5f   : > { %1087 = vperm.xlu1 %1727, %v2053_v9  }
  0x61   : > { %963 = vperm.xlu0 %1726, %v2074_v24  }
  0x63   : > { %1728 = vset.pattern.permute.xlu1 %v1809_v6 }
  0x64   : > { %943 = vperm.xlu1 %1728, %v731_v27  }
  0x65   : > { %967 = vperm.xlu0 %1726, %v2080_v28  }
  0x68   : > { %1729 = vset.pattern.permute.xlu1 %v1812_v22 }
  0x69   : > { %979 = vperm.xlu0 %1726, %v2085_v30   ;;  %1095 = vperm.xlu1 %1729, %v729_v17  }
  0x6d   : > { %1737 = vset.pattern.permute.xlu0 %v1812_v22  ;;  %1099 = vperm.xlu1 %1729, %v2064_v16  }
  0x6e   : > { %1079 = vperm.xlu0 %1737, %v2047_v5  }
  0x71   : > { %1730 = vset.pattern.permute.xlu1 %v1809_v6 }
  0x72   : > { %1091 = vperm.xlu0 %1737, %v2059_v12   ;;  %955 = vperm.xlu1 %1730, %v2093_v32  }
  0x76   : > { %1103 = vperm.xlu0 %1737, %v731_v27   ;;  %1731 = vset.pattern.permute.xlu1 %v1812_v22 }
  0x77   : > { %1107 = vperm.xlu1 %1731, %v2068_v19  }
  0x7a   : > { %1119 = vperm.xlu0 %1737, %v735_v34  }
  0x7b   : > { %1732 = vset.pattern.permute.xlu1 %v1809_v6 }
  0x7c   : > { %959 = vperm.xlu1 %1732, %v735_v34  }
  0x7e   : > { %1135 = vperm.xlu0 %1737, %v739_v36  }
  0x80   : > { %1733 = vset.pattern.permute.xlu1 %v1812_v22 }
  0x81   : > { %1111 = vperm.xlu1 %1733, %v733_v23  }
  0x82   : > { %1740 = vset.pattern.permute.xlu0 %v1813_v37 }
  0x83   : > { %748 = vperm.xlu0 %1740, %v726_v13  }
  0x85   : > { %1115 = vperm.xlu1 %1733, %v2093_v32  }
  0x87   : > { %763 = vperm.xlu0 %1740, %v729_v17  }
  0x89   : > { %1734 = vset.pattern.permute.xlu1 %v1809_v6 }
  0x8a   : > { %971 = vperm.xlu1 %1734, %v2107_v39  }
  0x8b   : > { %773 = vperm.xlu0 %1740, %v731_v27   ;;  %v291_v27 = vld [vmem:[%s1933_s11 + $0x80] sm:$0xff] }
  0x8c   : > { %v411_v40 = vpop.permute.xlu1 %410 }
  0x8e   : > { %1735 = vset.pattern.permute.xlu1 %v1812_v22 }
  0x8f   : > { %v1692_v41 = vpop.permute.xlu0 %1691  ;;  %783 = vperm.xlu0 %1740, %v733_v23   ;;  %1123 = vperm.xlu1 %1735, %v2074_v24  }
  0x90   : > { %v1693_v43 = vunpack.i.l.bf16 %v1692_v41  ;;  %v1694_v44 = vunpack.i.h.bf16 %v1692_v41  ;;  %v1697_v45 = vpop.permute.xlu1 %1696 }
  0x91   : > { %v1698_v50 = vunpack.i.l.bf16 %v1697_v45  ;;  %v1699_v54 = vunpack.i.h.bf16 %v1697_v45  ;;  %v287_v45 = vld [vmem:[%s1933_s11 + $0x50] sm:$0xff] }
  0x92   : > { %v457_v46 = vsel %vm456_vm0, %v280_v42, %v1693_v43  ;;  %v458_v52 = vsel %vm456_vm0, %v281_v47, %v1694_v44  ;;  %v286_v42 = vld [vmem:[%s1933_s11 + $0x48] sm:$0xff] }
  0x93   : > { %v409_v48 = vpop.permute.xlu0 %408  ;;  %793 = vperm.xlu0 %1740, %v735_v34   ;;  %1736 = vset.pattern.permute.xlu1 %v1809_v6  ;;  %v475_v56 = vsel %vm473_vm2, %v458_v52, %v411_v40  ;;  %v459_v60 = vsel %vm456_vm0, %v282_v53, %v1698_v50  ;;  %v466_v0 = vsel %vm456_vm0, %v289_v57, %v1699_v54  ;;  %v294_v54 = vld [vmem:[%s1933_s11 + $0xa8] sm:$0xff] }
  0x94   : > { %1489 = vmatprep.mubr.msk.f32.mxu0 %vm508_vm1, %v409_v48  ;;  %v474_v49 = vsel %vm473_vm2, %v457_v46, %v409_v48  ;;  %v1702_v51 = vpop.permute.xlu1 %1701  ;;  %975 = vperm.xlu1 %1736, %v739_v36  }
  0x95   : > { %606 = vmatmul.mubr.f32.vlgmr.msra.gmra.mrb[0].mxu0 %v474_v49  ;;  %v1704_v58 = vunpack.i.h.bf16 %v1702_v51  ;;  %v1703_v6 = vunpack.i.l.bf16 %v1702_v51  ;;  %v293_v51 = vld [vmem:[%s1933_s11 + $0x98] sm:$0xff] }
  0x96   : > { %1490 = vmatprep.mubr.msk.f32.mxu0 %vm508_vm1, %v411_v40 }
  0x97   : > { %v413_v55 = vpop.permute.xlu0 %412  ;;  %803 = vperm.xlu0 %1740, %v2080_v28   ;;  %v460_v7 = vsel %vm456_vm0, %v283_v61, %v1703_v6  ;;  %v467_v8 = vsel %vm456_vm0, %v290_v62, %v1704_v58  ;;  %v295_v62 = vld [vmem:[%s1933_s11 + $0xb0] sm:$0xff] }
  0x98   : > { %v415_v59 = vpop.permute.xlu1 %414  ;;  %1738 = vset.pattern.permute.xlu1 %v1812_v22  ;;  %v476_v1 = vsel %vm473_vm2, %v459_v60, %v413_v55 }
  0x99   : > { %611 = vmatmul.mubr.f32.gmra.mrb[2].mxu0 %v475_v56  ;;  %1127 = vperm.xlu1 %1738, %v2080_v28   ;;  %v477_v14 = vsel %vm473_vm2, %v460_v7, %v415_v59 }
  0x9a   : > { %1491 = vmatprep.mubr.msk.f32.mxu0 %vm508_vm1, %v413_v55 }
  0x9b   : > { %v427_v63 = vpop.permute.xlu0 %426  ;;  %813 = vperm.xlu0 %1740, %v739_v36  }
  0x9c   : > { %1498 = vmatprep.mubr.msk.f32.mxu1 %vm508_vm1, %v427_v63  ;;  %v483_v2 = vsel %vm473_vm2, %v466_v0, %v427_v63  ;;  %v429_v4 = vpop.permute.xlu1 %428 }
  0x9d   : > { %616 = vmatmul.mubr.f32.gmra.mrb[4].mxu0 %v476_v1  ;;  %651 = vmatmul.mubr.f32.vlgmr.msra.gmra.mrb[0].mxu1 %v483_v2  ;;  %v484_v15 = vsel %vm473_vm2, %v467_v8, %v429_v4 }
  0x9e   : > { %1492 = vmatprep.mubr.msk.f32.mxu0 %vm508_vm1, %v415_v59  ;;  %1499 = vmatprep.mubr.msk.f32.mxu1 %vm508_vm1, %v429_v4  ;;  %v288_v59 = vld [vmem:[%s1933_s11 + $0x60] sm:$0xff] }
  0x9f   : > { %v1707_v10 = vpop.permute.xlu0 %1706  ;;  %1131 = vperm.xlu1 %1738, %v2107_v39   ;;  %1741 = vset.pattern.permute.xlu0 %v1812_v22 }
  0xa0   : > { %v1708_v13 = vunpack.i.l.bf16 %v1707_v10  ;;  %v1712_v17 = vpop.permute.xlu1 %1711  ;;  %v1709_v23 = vunpack.i.h.bf16 %v1707_v10 }
  0xa1   : > { %621 = vmatmul.mubr.f32.gmra.mrb[6].mxu0 %v477_v14  ;;  %656 = vmatmul.mubr.f32.gmra.mrb[2].mxu1 %v484_v15  ;;  %v1713_v20 = vunpack.i.l.bf16 %v1712_v17  ;;  %v1714_v28 = vunpack.i.h.bf16 %v1712_v17 }
  0xa2   : > { %v461_v21 = vsel %vm456_vm0, %v284_v11, %v1708_v13  ;;  %v468_v35 = vsel %vm456_vm0, %v291_v27, %v1709_v23 }
  0xa3   : > { %v417_v25 = vpop.permute.xlu0 %416  ;;  %1139 = vperm.xlu1 %1738, %v2085_v30   ;;  %v462_v26 = vsel %vm456_vm0, %v285_v18, %v1713_v20  ;;  %v469_v40 = vsel %vm456_vm0, %v292_v33, %v1714_v28  ;;  %v1301_v33 = vld [vmem:[%s2559_s4] sm:$0xff] }
  0xa4   : > { %1493 = vmatprep.mubr.msk.f32.mxu0 %vm508_vm1, %v417_v25  ;;  %v478_v22 = vsel %vm473_vm2, %v461_v21, %v417_v25  ;;  %v419_v29 = vpop.permute.xlu1 %418 }
  0xa5   : > { %626 = vmatmul.mubr.f32.gmra.mrb[8].mxu0 %v478_v22  ;;  %v479_v31 = vsel %vm473_vm2, %v462_v26, %v419_v29 }
  0xa6   : > { %1494 = vmatprep.mubr.msk.f32.mxu0 %vm508_vm1, %v419_v29 }
  0xa7   : > { %v431_v34 = vpop.permute.xlu0 %430  ;;  %1739 = vset.pattern.permute.xlu1 %v1813_v37 }
  0xa8   : > { %1500 = vmatprep.mubr.msk.f32.mxu1 %vm508_vm1, %v431_v34  ;;  %v485_v36 = vsel %vm473_vm2, %v468_v35, %v431_v34  ;;  %743 = vperm.xlu1 %1739, %v2047_v5   ;;  %v433_v38 = vpop.permute.xlu1 %432  ;;  %v1302_v34 = vld [vmem:[%s2559_s4 + $0x8] sm:$0xff]  ;;  %v1303_v35 = vld [vmem:[%s2559_s4 + $0x10] sm:$0xff] }
  0xa9   : > { %631 = vmatmul.mubr.f32.gmra.mrb[10].mxu0 %v479_v31  ;;  %661 = vmatmul.mubr.f32.gmra.mrb[4].mxu1 %v485_v36  ;;  %v486_v37 = vsel %vm473_vm2, %v469_v40, %v433_v38  ;;  %v1605_v36 = vpack.c.bf16 %v1302_v34, %v1301_v33 }
  0xaa   : > { %1501 = vmatprep.mubr.msk.f32.mxu1 %vm508_vm1, %v433_v38  ;;  %v1304_v38 = vld [vmem:[%s2559_s4 + $0x18] sm:$0xff] }
  0xab   : > { %v1717_v41 = vpop.permute.xlu0 %1716  ;;  %1606 = vmatpush3.bf16.msra.mxu1 %v1605_v36 }
  0xac   : > { %v1718_v43 = vunpack.i.l.bf16 %v1717_v41  ;;  %753 = vperm.xlu1 %1739, %v2053_v9   ;;  %v1722_v44 = vpop.permute.xlu1 %1721  ;;  %v1719_v47 = vunpack.i.h.bf16 %v1717_v41  ;;  %v1608_v41 = vpack.c.bf16 %v1304_v38, %v1303_v35  ;;  %1607 = vmatprep.subr.bf16.mxu1 %v1808_v3 }
  0xad   : > { %666 = vmatmul.mubr.f32.gmra.mrb[6].mxu1 %v486_v37  ;;  %v1723_v5 = vunpack.i.l.bf16 %v1722_v44  ;;  %v1724_v52 = vunpack.i.h.bf16 %v1722_v44  ;;  %v1306_v37 = vld [vmem:[%s2559_s4 + $0x28] sm:$0xff] }
  0xae   : > { %v463_v46 = vsel %vm456_vm0, %v286_v42, %v1718_v43  ;;  %v470_v56 = vsel %vm456_vm0, %v293_v51, %v1719_v47  ;;  %v1305_v43 = vld [vmem:[%s2559_s4 + $0x20] sm:$0xff] }
  0xaf   : > { %v421_v48 = vpop.permute.xlu0 %420  ;;  %v464_v50 = vsel %vm456_vm0, %v287_v45, %v1723_v5  ;;  %v471_v58 = vsel %vm456_vm0, %v294_v54, %v1724_v52  ;;  %1609 = vmatpush3.bf16.msra.mxu1 %v1608_v41  ;;  %v1611_v44 = vpack.c.bf16 %v1306_v37, %v1305_v43  ;;  %v1307_v5 = vld [vmem:[%s2559_s4 + $0x30] sm:$0xff] }
  0xb0   : > { %1495 = vmatprep.mubr.msk.f32.mxu0 %vm508_vm1, %v421_v48  ;;  %v480_v49 = vsel %vm473_vm2, %v463_v46, %v421_v48  ;;  %758 = vperm.xlu1 %1739, %v2059_v12   ;;  %v423_v9 = vpop.permute.xlu1 %422  ;;  %v1308_v46 = vld [vmem:[%s2559_s4 + $0x38] sm:$0xff] }
  0xb1   : > { %636 = vmatmul.mubr.f32.gmra.mrb[12].mxu0 %v480_v49  ;;  %v481_v53 = vsel %vm473_vm2, %v464_v50, %v423_v9  ;;  %1610 = vmatprep.subr.bf16.mxu1 %v1808_v3  ;;  %v1614_v48 = vpack.c.bf16 %v1308_v46, %v1307_v5 }
  0xb2   : > { %1496 = vmatprep.mubr.msk.f32.mxu0 %vm508_vm1, %v423_v9 }
  0xb3   : > { %v435_v55 = vpop.permute.xlu0 %434  ;;  %1612 = vmatpush3.bf16.msra.mxu1 %v1611_v44 }
  0xb4   : > { %1502 = vmatprep.mubr.msk.f32.mxu1 %vm508_vm1, %v435_v55  ;;  %v487_v57 = vsel %vm473_vm2, %v470_v56, %v435_v55  ;;  %768 = vperm.xlu1 %1739, %v2064_v16   ;;  %v437_v12 = vpop.permute.xlu1 %436  ;;  %v2285_v56 = vld [vmem:[%s2558_s3] ss:$0 sm:$0xff] }
  0xb5   : > { %641 = vmatmul.mubr.f32.gmra.mrb[14].mxu0 %v481_v53  ;;  %671 = vmatmul.mubr.f32.gmra.mrb[8].mxu1 %v487_v57  ;;  %v488_v60 = vsel %vm473_vm2, %v471_v58, %v437_v12 }
  0xb6   : > { %1503 = vmatprep.mubr.msk.f32.mxu1 %vm508_vm1, %v437_v12  ;;  %1613 = vmatprep.subr.bf16.mxu1 %v1808_v3 }
  0xb7   : > { %v361_v6 = vpop.permute.xlu0 %360  ;;  %1615 = vmatpush3.bf16.msra.mxu1 %v1614_v48 }
  0xb8   : > { %778 = vperm.xlu1 %1739, %v2068_v19   ;;  %v375_v61 = vpop.permute.xlu1 %374  ;;  %v465_v63 = vsel %vm456_vm0, %v288_v59, %v361_v6  ;;  %1616 = vmatprep.subr.bf16.mxu1 %v1808_v3 }
  0xb9   : > { %676 = vmatmul.mubr.f32.gmra.mrb[10].mxu1 %v488_v60  ;;  %v472_v1 = vsel %vm456_vm0, %v295_v62, %v375_v61 }
  0xbb   : > { %v425_v0 = vpop.permute.xlu0 %424 }
  0xbc   : > { %1497 = vmatprep.mubr.msk.f32.mxu0 %vm508_vm1, %v425_v0  ;;  %v482_v16 = vsel %vm473_vm2, %v465_v63, %v425_v0  ;;  %788 = vperm.xlu1 %1739, %v2093_v32  }
  0xbd   : > { %646 = vmatmul.mubr.f32.gmra.mrb[16].mxu0 %v482_v16 }
  0xbf   : > { %v439_v2 = vpop.permute.xlu0 %438 }
  0xc0   : > { %1504 = vmatprep.mubr.msk.f32.mxu1 %vm508_vm1, %v439_v2  ;;  %v489_v19 = vsel %vm473_vm2, %v472_v1, %v439_v2  ;;  %798 = vperm.xlu1 %1739, %v2074_v24  }
  0xc1   : > { %681 = vmatmul.mubr.f32.gmra.mrb[12].mxu1 %v489_v19 }
  0xc4   : > { %808 = vperm.xlu1 %1739, %v2107_v39  }
  0xc8   : > { %818 = vperm.xlu1 %1739, %v2085_v30  }
  0xc9   : > { %v2194_v4 = vpop.permute.xlu1 %919 }
  0xcd   : > { %v2196_v7 = vpop.permute.xlu1 %927 }
  0xd0   : > { %v924_v30 = vpop.permute.xlu0 %923 }
  0xd1   : > { %v2198_v32 = vpop.permute.xlu1 %931 }
  0xd4   : > { %v2216_v17 = vpop.permute.xlu0 %935 }
  0xd5   : > { %v2200_v8 = vpop.permute.xlu1 %939 }
  0xd8   : > { %v2220_v20 = vpop.permute.xlu0 %947 }
  0xda   : > { %v2202_v10 = vpop.permute.xlu1 %1083 }
  0xdc   : > { %v2224_v23 = vpop.permute.xlu0 %951 }
  0xde   : > { %v2204_v11 = vpop.permute.xlu1 %1087 }
  0xe0   : > { %v2228_v22 = vpop.permute.xlu0 %963 }
  0xe3   : > { %v2206_v13 = vpop.permute.xlu1 %943 }
  0xe4   : > { %v2232_v27 = vpop.permute.xlu0 %967 }
  0xe8   : > { %v2208_v24 = vpop.permute.xlu1 %1095  ;;  %v2236_v29 = vpop.permute.xlu0 %979 }
  0xec   : > { %v2210_v14 = vpop.permute.xlu1 %1099 }
  0xed   : > { %v1080_v40 = vpop.permute.xlu0 %1079 }
  0xf1   : > { %v2212_v39 = vpop.permute.xlu1 %955  ;;  %v2261_v45 = vpop.permute.xlu0 %1091 }
  0xf5   : > { %v2273_v49 = vpop.permute.xlu0 %1103 }
  0xf6   : > { %v2214_v15 = vpop.permute.xlu1 %1107 }
  0xf9   : > { %v2278_v51 = vpop.permute.xlu0 %1119 }
  0xfb   : > { %v2218_v18 = vpop.permute.xlu1 %959 }
  0xfd   : > { %v2280_v9 = vpop.permute.xlu0 %1135 }
 0x100   : > { %v2222_v21 = vpop.permute.xlu1 %1111 }
 0x102   : > { %v749_v54 = vpop.permute.xlu0 %748 }
 0x104   : > { %v2226_v25 = vpop.permute.xlu1 %1115 }
 0x106   : > { %v2287_v57 = vpop.permute.xlu0 %763 }
 0x109   : > { %v2230_v26 = vpop.permute.xlu1 %971 }
 0x10a   : > { %v2294_v1 = vpop.permute.xlu0 %773 }
 0x10e   : > { %v2234_v28 = vpop.permute.xlu1 %1123 }
 0x113   : > { %v2238_v31 = vpop.permute.xlu1 %975 }
 0x118   : > { %v2252_v42 = vpop.permute.xlu1 %1127 }
 0x11e   : > { %v2270_v47 = vpop.permute.xlu1 %1131 }
 0x122   : > { %v2275_v50 = vpop.permute.xlu1 %1139 }
 0x127   : > { %v744_v52 = vpop.permute.xlu1 %743 }
 0x12b   : > { %v754_v53 = vpop.permute.xlu1 %753 }
 0x12f   : > { %v759_v55 = vpop.permute.xlu1 %758 }
 0x133   : > { %v2290_v59 = vpop.permute.xlu1 %768 }
 0x137   : > { %v2297_v34 = vpop.permute.xlu1 %778 }
 0x168   : > { %v607_v12 = vpop.f32.mrb[0].mxu0 }
 0x169   : > { %v693_v58 = vadd.f32 %v2285_v56, %v607_v12  ;;  %v609_v6 = vpop.f32.mrb[1].mxu0 }
 0x16a   : > { %v2309_v6 = vpop.permute.xlu0 %783 }
 0x16b   : > { %v821_v60 = vadd.f32 %v744_v52, %v693_v58  ;;  %v982_v61 = vadd.f32 %v2194_v4, %v693_v58  ;;  %v1142_v62 = vadd.f32 %v1080_v40, %v693_v58 }
 0x16c   : > { %v612_v63 = vpop.f32.mrb[2].mxu0 }
 0x16d   : > { %v694_v0 = vadd.f32 %v2285_v56, %v612_v63  ;;  %v614_v16 = vpop.f32.mrb[3].mxu0  ;;  %v838_v35 = vsel %vm837_vm3, %v821_v60, -inf  ;;  %v998_v36 = vsel %vm837_vm3, %v982_v61, -inf  ;;  %v1158_v4 = vsel %vm837_vm3, %v1142_v62, -inf }
 0x16f   : > { %v822_v2 = vadd.f32 %v749_v54, %v694_v0  ;;  %v983_v19 = vadd.f32 %v924_v30, %v694_v0  ;;  %v1143_v33 = vadd.f32 %v2202_v10, %v694_v0 }
 0x170   : > { %v617_v38 = vpop.f32.mrb[4].mxu0  ;;  %v652_v40 = vpop.f32.mrb[0].mxu1 }
 0x171   : > { %v839_v41 = vsel %vm837_vm3, %v822_v2, -inf  ;;  %v999_v43 = vsel %vm837_vm3, %v983_v19, -inf  ;;  %v1159_v37 = vsel %vm837_vm3, %v1143_v33, -inf  ;;  %v695_v30 = vadd.f32 %v2285_v56, %v617_v38  ;;  %v619_v44 = vpop.f32.mrb[5].mxu0  ;;  %v654_v10 = vpop.f32.mrb[1].mxu1 }
 0x172   : > { %v840_v5 = vmax.f32 %v838_v35, %v839_v41  ;;  %v1000_v46 = vmax.f32 %v998_v36, %v999_v43  ;;  %v1160_v48 = vmax.f32 %v1158_v4, %v1159_v37  ;;  %v702_v52 = vadd.f32 %v2285_v56, %v652_v40  ;;  %v789_v4 = vpop.permute.xlu1 %788 }
 0x173   : > { %v823_v54 = vadd.f32 %v754_v53, %v695_v30  ;;  %v984_v12 = vadd.f32 %v2196_v7, %v695_v30  ;;  %v1144_v58 = vadd.f32 %v2204_v11, %v695_v30 }
 0x174   : > { %v841_v60 = vrot.slane %v840_v5, 4  ;;  %v1001_v61 = vrot.slane %v1000_v46, 4  ;;  %v1161_v62 = vrot.slane %v1160_v48, 4  ;;  %v991_v63 = vadd.f32 %v2212_v39, %v702_v52  ;;  %v622_v0 = vpop.f32.mrb[6].mxu0  ;;  %v657_v16 = vpop.f32.mrb[2].mxu1 }
 0x175   : > { %v847_v2 = vsel %vm837_vm3, %v823_v54, -inf  ;;  %v624_v19 = vpop.f32.mrb[7].mxu0  ;;  %v659_v33 = vpop.f32.mrb[3].mxu1  ;;  %v1007_v7 = vsel %vm837_vm3, %v984_v12, -inf  ;;  %v1167_v11 = vsel %vm837_vm3, %v1144_v58, -inf  ;;  %v1151_v38 = vadd.f32 %v2226_v25, %v702_v52 }
 0x176   : > { %v842_v35 = vmax.f32 %v840_v5, %v841_v60  ;;  %v1002_v36 = vmax.f32 %v1000_v46, %v1001_v61  ;;  %v1162_v53 = vmax.f32 %v1160_v48, %v1161_v62  ;;  %v696_v40 = vadd.f32 %v2285_v56, %v622_v0 }
 0x177   : > { %v703_v39 = vadd.f32 %v2285_v56, %v657_v16  ;;  %v2319_v30 = vsel %vm837_vm3, %v991_v63, -inf  ;;  %v830_v10 = vadd.f32 %v789_v4, %v702_v52  ;;  %v794_v52 = vpop.permute.xlu0 %793 }
 0x178   : > { %v843_v41 = vrot.slane %v842_v35, 2  ;;  %v1003_v43 = vrot.slane %v1002_v36, 2  ;;  %v1163_v37 = vrot.slane %v1162_v53, 2  ;;  %v627_v44 = vpop.f32.mrb[8].mxu0  ;;  %v824_v5 = vadd.f32 %v759_v55, %v696_v40 }
 0x179   : > { %v985_v46 = vadd.f32 %v2198_v32, %v696_v40  ;;  %v1145_v48 = vadd.f32 %v2261_v45, %v696_v40  ;;  %v629_v54 = vpop.f32.mrb[9].mxu0  ;;  %v992_v60 = vadd.f32 %v2218_v18, %v703_v39  ;;  %v1152_v0 = vadd.f32 %v2278_v51, %v703_v39 }
 0x17a   : > { %v844_v12 = vmax.f32 %v842_v35, %v843_v41  ;;  %v1004_v25 = vmax.f32 %v1002_v36, %v1003_v43  ;;  %v1164_v58 = vmax.f32 %v1162_v53, %v1163_v37  ;;  %v848_v61 = vsel %vm837_vm3, %v824_v5, -inf }
 0x17b   : > { %v1008_v62 = vsel %vm837_vm3, %v985_v46, -inf  ;;  %v1168_v63 = vsel %vm837_vm3, %v1145_v48, -inf  ;;  %v849_v19 = vmax.f32 %v847_v2, %v848_v61  ;;  %v2329_v35 = vsel %vm837_vm3, %v1151_v38, -inf }
 0x17c   : > { %v845_v55 = vrot.slane %v844_v12, 1  ;;  %v1005_v16 = vrot.slane %v1004_v25, 1  ;;  %v1165_v32 = vrot.slane %v1164_v58, 1  ;;  %v632_v45 = vpop.f32.mrb[10].mxu0  ;;  %v662_v33 = vpop.f32.mrb[4].mxu1  ;;  %v2332_v18 = vsel %vm837_vm3, %v830_v10, -inf }
 0x17d   : > { %v1009_v36 = vmax.f32 %v1007_v7, %v1008_v62  ;;  %v1169_v53 = vmax.f32 %v1167_v11, %v1168_v63  ;;  %v664_v4 = vpop.f32.mrb[5].mxu1  ;;  %v634_v40 = vpop.f32.mrb[11].mxu0  ;;  %v850_v51 = vrot.slane %v849_v19, 4  ;;  %v1043_v37 = vsel %vm837_vm3, %v992_v60, -inf }
 0x17e   : > { %v846_v41 = vmax.f32 %v844_v12, %v845_v55  ;;  %v1006_v43 = vmax.f32 %v1004_v25, %v1005_v16  ;;  %v1203_v2 = vsel %vm837_vm3, %v1152_v0, -inf  ;;  %v697_v48 = vadd.f32 %v2285_v56, %v627_v44 }
 0x17f   : > { %v1010_v5 = vrot.slane %v1009_v36, 4  ;;  %v1170_v46 = vrot.slane %v1169_v53, 4  ;;  %v1166_v54 = vmax.f32 %v1164_v58, %v1165_v32  ;;  %v851_v10 = vmax.f32 %v849_v19, %v850_v51 }
 0x180   : > { %v2337_v38 = vadd.f32 -100.0, %v846_v41  ;;  %v831_v61 = vadd.f32 %v794_v52, %v703_v39  ;;  %v667_v7 = vpop.f32.mrb[6].mxu1  ;;  %v2339_v11 = vadd.f32 -100.0, %v1006_v43  ;;  %v825_v25 = vadd.f32 %v2287_v57, %v697_v48 }
 0x181   : > { %v1011_v62 = vmax.f32 %v1009_v36, %v1010_v5  ;;  %v1171_v12 = vmax.f32 %v1169_v53, %v1170_v46  ;;  %v669_v63 = vpop.f32.mrb[7].mxu1  ;;  %v852_v60 = vrot.slane %v851_v10, 2  ;;  %v986_v55 = vadd.f32 %v2216_v17, %v697_v48 }
 0x182   : > { %v1146_v0 = vadd.f32 %v2208_v24, %v697_v48  ;;  %v698_v44 = vadd.f32 %v2285_v56, %v632_v45  ;;  %v856_v58 = vsel %vm837_vm3, %v825_v25, -inf  ;;  %v704_v39 = vadd.f32 %v2285_v56, %v662_v33 }
 0x183   : > { %v1012_v16 = vrot.slane %v1011_v62, 2  ;;  %v1172_v4 = vrot.slane %v1171_v12, 2  ;;  %v853_v52 = vmax.f32 %v851_v10, %v852_v60  ;;  %v1016_v32 = vsel %vm837_vm3, %v986_v55, -inf  ;;  %v799_v10 = vpop.permute.xlu1 %798 }
 0x184   : > { %v1176_v19 = vsel %vm837_vm3, %v1146_v0, -inf  ;;  %v826_v57 = vadd.f32 %v2290_v59, %v698_v44  ;;  %v637_v36 = vpop.f32.mrb[12].mxu0  ;;  %v987_v24 = vadd.f32 %v2200_v8, %v698_v44  ;;  %v1147_v45 = vadd.f32 %v2210_v14, %v698_v44 }
 0x185   : > { %v1013_v53 = vmax.f32 %v1011_v62, %v1012_v16  ;;  %v1173_v17 = vmax.f32 %v1171_v12, %v1172_v4  ;;  %v639_v40 = vpop.f32.mrb[13].mxu0  ;;  %v854_v41 = vrot.slane %v853_v52, 1  ;;  %v993_v33 = vadd.f32 %v2228_v22, %v704_v39 }
 0x186   : > { %v857_v43 = vsel %vm837_vm3, %v826_v57, -inf  ;;  %v1153_v51 = vadd.f32 %v2234_v28, %v704_v39  ;;  %v1017_v59 = vsel %vm837_vm3, %v987_v24, -inf  ;;  %v1177_v8 = vsel %vm837_vm3, %v1147_v45, -inf }
 0x187   : > { %v1014_v5 = vrot.slane %v1013_v53, 1  ;;  %v1174_v46 = vrot.slane %v1173_v17, 1  ;;  %v858_v48 = vmax.f32 %v856_v58, %v857_v43  ;;  %v855_v62 = vmax.f32 %v853_v52, %v854_v41 }
 0x188   : > { %v1018_v12 = vmax.f32 %v1016_v32, %v1017_v59  ;;  %v1044_v14 = vsel %vm837_vm3, %v993_v33, -inf  ;;  %v2358_v25 = vpop.f32.mrb[14].mxu0  ;;  %v2360_v63 = vpop.f32.mrb[8].mxu1  ;;  %v2362_v60 = vadd.f32 -100.0, %v1166_v54  ;;  %v1178_v55 = vmax.f32 %v1176_v19, %v1177_v8 }
 0x189   : > { %v1015_v22 = vmax.f32 %v1013_v53, %v1014_v5  ;;  %v859_v28 = vrot.slane %v858_v48, 4  ;;  %v674_v0 = vpop.f32.mrb[9].mxu1  ;;  %v644_v44 = vpop.f32.mrb[15].mxu0  ;;  %v883_v16 = vsel %vm837_vm3, %v831_v61, -inf  ;;  %v1045_v58 = vmax.f32 %v1043_v37, %v1044_v14 }
 0x18a   : > { %v1019_v4 = vrot.slane %v1018_v12, 4  ;;  %v1204_v52 = vsel %vm837_vm3, %v1153_v51, -inf  ;;  %v2366_v32 = vadd.f32 -100.0, %v855_v62  ;;  %v1175_v57 = vmax.f32 %v1173_v17, %v1174_v46  ;;  %v804_v14 = vpop.permute.xlu0 %803 }
 0x18b   : > { %v860_v24 = vmax.f32 %v858_v48, %v859_v28  ;;  %v1179_v45 = vrot.slane %v1178_v55, 4  ;;  %v1046_v41 = vrot.slane %v1045_v58, 4  ;;  %v1205_v54 = vmax.f32 %v1203_v2, %v1204_v52 }
 0x18c   : > { %v1020_v40 = vmax.f32 %v1018_v12, %v1019_v4  ;;  %v832_v43 = vadd.f32 %v799_v10, %v704_v39  ;;  %v677_v53 = vpop.f32.mrb[10].mxu1  ;;  %v2368_v33 = vadd.f32 -100.0, %v1015_v22  ;;  %v705_v61 = vadd.f32 %v2285_v56, %v667_v7 }
 0x18d   : > { %v861_v19 = vrot.slane %v860_v24, 2  ;;  %v1180_v5 = vmax.f32 %v1178_v55, %v1179_v45  ;;  %v679_v59 = vpop.f32.mrb[11].mxu1  ;;  %v1047_v8 = vmax.f32 %v1045_v58, %v1046_v41  ;;  %v1206_v51 = vrot.slane %v1205_v54, 4 }
 0x18e   : > { %v1021_v37 = vrot.slane %v1020_v40, 2  ;;  %v884_v62 = vsel %vm837_vm3, %v832_v43, -inf  ;;  %v994_v12 = vadd.f32 %v2232_v27, %v705_v61  ;;  %v699_v22 = vadd.f32 %v2285_v56, %v637_v36 }
 0x18f   : > { %v862_v17 = vmax.f32 %v860_v24, %v861_v19  ;;  %v1181_v46 = vrot.slane %v1180_v5, 2  ;;  %v885_v48 = vmax.f32 %v883_v16, %v884_v62  ;;  %v1048_v39 = vrot.slane %v1047_v8, 2 }
 0x190   : > { %v1022_v2 = vmax.f32 %v1020_v40, %v1021_v37  ;;  %v1207_v10 = vmax.f32 %v1205_v54, %v1206_v51  ;;  %v647_v28 = vpop.f32.mrb[16].mxu0  ;;  %v1154_v44 = vadd.f32 %v2252_v42, %v705_v61  ;;  %v2375_v58 = vadd.f32 -100.0, %v1175_v57 }
 0x191   : > { %v863_v55 = vrot.slane %v862_v17, 1  ;;  %v1182_v7 = vmax.f32 %v1180_v5, %v1181_v46  ;;  %v886_v0 = vrot.slane %v885_v48, 4  ;;  %v649_v4 = vpop.f32.mrb[17].mxu0  ;;  %v1052_v16 = vsel %vm837_vm3, %v994_v12, -inf  ;;  %v809_v12 = vpop.permute.xlu1 %808 }
 0x192   : > { %v1023_v52 = vrot.slane %v1022_v2, 1  ;;  %v1208_v24 = vrot.slane %v1207_v10, 2  ;;  %v833_v41 = vadd.f32 %v804_v14, %v705_v61  ;;  %v2378_v43 = vmax.f32 %v1047_v8, %v1048_v39 }
 0x193   : > { %v864_v27 = vmax.f32 %v862_v17, %v863_v55  ;;  %v1183_v45 = vrot.slane %v1182_v7, 1  ;;  %v887_v40 = vmax.f32 %v885_v48, %v886_v0  ;;  %v827_v36 = vadd.f32 %v2294_v1, %v699_v22 }
 0x194   : > { %v1024_v54 = vmax.f32 %v1022_v2, %v1023_v52  ;;  %v988_v19 = vadd.f32 %v2206_v13, %v699_v22  ;;  %v682_v5 = vpop.f32.mrb[12].mxu1  ;;  %v2382_v59 = vmax.f32 %v1207_v10, %v1208_v24  ;;  %v1212_v37 = vsel %vm837_vm3, %v1154_v44, -inf }
 0x195   : > { %v1184_v42 = vmax.f32 %v1182_v7, %v1183_v45  ;;  %v888_v57 = vrot.slane %v887_v40, 2  ;;  %v684_v51 = vpop.f32.mrb[13].mxu1  ;;  %v2385_v62 = vadd.f32 -100.0, %v864_v27  ;;  %v892_v61 = vsel %vm837_vm3, %v833_v41, -inf }
 0x196   : > { %v2387_v17 = vadd.f32 -100.0, %v1024_v54  ;;  %v1148_v8 = vadd.f32 %v2273_v49, %v699_v22  ;;  %v865_v1 = vsel %vm837_vm3, %v827_v36, -inf  ;;  %v700_v13 = vadd.f32 %v2285_v56, %v2358_v25  ;;  %v814_v36 = vpop.permute.xlu0 %813 }
 0x197   : > { %v889_v46 = vmax.f32 %v887_v40, %v888_v57  ;;  %v706_v48 = vadd.f32 %v2285_v56, %v2360_v63  ;;  %v2396_v2 = vadd.f32 -100.0, %v1184_v42  ;;  %v1025_v39 = vsel %vm837_vm3, %v988_v19, -inf }
 0x198   : > { %v1185_v10 = vsel %vm837_vm3, %v1148_v8, -inf  ;;  %v707_v14 = vadd.f32 %v2285_v56, %v677_v53  ;;  %v828_v49 = vadd.f32 %v2297_v34, %v700_v13  ;;  %v989_v22 = vadd.f32 %v2220_v20, %v700_v13 }
 0x199   : > { %v1149_v55 = vadd.f32 %v2214_v15, %v700_v13  ;;  %v701_v25 = vadd.f32 %v2285_v56, %v647_v28  ;;  %v995_v7 = vadd.f32 %v2230_v26, %v706_v48  ;;  %v1155_v63 = vadd.f32 %v2270_v47, %v706_v48 }
 0x19a   : > { %v834_v0 = vadd.f32 %v809_v12, %v706_v48  ;;  %v2408_v44 = vadd.f32 %v2285_v56, %v682_v5  ;;  %v890_v4 = vrot.slane %v889_v46, 1  ;;  %v866_v52 = vsel %vm837_vm3, %v828_v49, -inf }
 0x19b   : > { %v1026_v53 = vsel %vm837_vm3, %v989_v22, -inf  ;;  %v1186_v34 = vsel %vm837_vm3, %v1149_v55, -inf  ;;  %v867_v20 = vmax.f32 %v865_v1, %v866_v52  ;;  %v1053_v28 = vsel %vm837_vm3, %v995_v7, -inf }
 0x19c   : > { %v1027_v24 = vmax.f32 %v1025_v39, %v1026_v53  ;;  %v1187_v15 = vmax.f32 %v1185_v10, %v1186_v34  ;;  %v1054_v27 = vmax.f32 %v1052_v16, %v1053_v28  ;;  %v1213_v26 = vsel %vm837_vm3, %v1155_v63, -inf }
 0x19d   : > { %v893_v47 = vsel %vm837_vm3, %v834_v0, -inf  ;;  %v996_v56 = vadd.f32 %v2238_v31, %v707_v14  ;;  %v868_v45 = vrot.slane %v867_v20, 4  ;;  %v1214_v54 = vmax.f32 %v1212_v37, %v1213_v26 }
 0x19e   : > { %v1028_v40 = vrot.slane %v1027_v24, 4  ;;  %v1188_v41 = vrot.slane %v1187_v15, 4  ;;  %v2417_v19 = vmax.f32 %v889_v46, %v890_v4  ;;  %v1055_v5 = vrot.slane %v1054_v27, 4 }
 0x19f   : > { %v894_v42 = vmax.f32 %v892_v61, %v893_v47  ;;  %v1156_v57 = vadd.f32 %v2280_v9, %v707_v14  ;;  %v869_v51 = vmax.f32 %v867_v20, %v868_v45  ;;  %v1215_v1 = vrot.slane %v1214_v54, 4 }
 0x1a0   : > { %v1029_v8 = vmax.f32 %v1027_v24, %v1028_v40  ;;  %v1189_v16 = vmax.f32 %v1187_v15, %v1188_v41  ;;  %v2420_v13 = vmax.f32 %v1054_v27, %v1055_v5  ;;  %v1061_v31 = vsel %vm837_vm3, %v996_v56, -inf  ;;  %v819_v41 = vpop.permute.xlu1 %818 }
 0x1a1   : > { %v895_v48 = vrot.slane %v894_v42, 4  ;;  %v835_v12 = vadd.f32 %v814_v36, %v707_v14  ;;  %v870_v39 = vrot.slane %v869_v51, 2  ;;  %v1221_v46 = vsel %vm837_vm3, %v1156_v57, -inf }
 0x1a2   : > { %v1030_v10 = vrot.slane %v1029_v8, 2  ;;  %v1190_v37 = vrot.slane %v1189_v16, 2  ;;  %v1057_v49 = vrot.slane %v2420_v13, 2  ;;  %v1216_v61 = vmax.f32 %v1214_v54, %v1215_v1 }
 0x1a3   : > { %v896_v22 = vmax.f32 %v894_v42, %v895_v48  ;;  %v829_v9 = vadd.f32 %v2309_v6, %v701_v25  ;;  %v871_v55 = vmax.f32 %v869_v51, %v870_v39  ;;  %v901_v0 = vsel %vm837_vm3, %v835_v12, -inf }
 0x1a4   : > { %v1031_v7 = vmax.f32 %v1029_v8, %v1030_v10  ;;  %v1191_v63 = vmax.f32 %v1189_v16, %v1190_v37  ;;  %v990_v14 = vadd.f32 %v2224_v23, %v701_v25  ;;  %v1150_v53 = vadd.f32 %v2222_v21, %v701_v25 }
 0x1a5   : > { %v897_v4 = vrot.slane %v896_v22, 2  ;;  %v874_v52 = vsel %vm837_vm3, %v829_v9, -inf  ;;  %v872_v34 = vrot.slane %v871_v55, 1  ;;  %v997_v26 = vadd.f32 %v2236_v29, %v2408_v44 }
 0x1a6   : > { %v1032_v20 = vrot.slane %v1031_v7, 1  ;;  %v1192_v24 = vrot.slane %v1191_v63, 1  ;;  %v876_v15 = vmax.f32 %v874_v52, %v2332_v18  ;;  %v1034_v6 = vsel %vm837_vm3, %v990_v14, -inf }
 0x1a7   : > { %v898_v28 = vmax.f32 %v896_v22, %v897_v4  ;;  %v1194_v27 = vsel %vm837_vm3, %v1150_v53, -inf  ;;  %v873_v47 = vmax.f32 %v871_v55, %v872_v34  ;;  %v1036_v25 = vmax.f32 %v1034_v6, %v2319_v30 }
 0x1a8   : > { %v1033_v56 = vmax.f32 %v1031_v7, %v1032_v20  ;;  %v1193_v23 = vmax.f32 %v1191_v63, %v1192_v24  ;;  %v877_v45 = vrot.slane %v876_v15, 4  ;;  %v1196_v18 = vmax.f32 %v1194_v27, %v2329_v35 }
 0x1a9   : > { %v899_v21 = vrot.slane %v898_v28, 1  ;;  %v1062_v40 = vsel %vm837_vm3, %v997_v26, -inf  ;;  %v2438_v54 = vadd.f32 -100.0, %v873_v47  ;;  %v1217_v5 = vrot.slane %v1216_v61, 2 }
 0x1aa   : > { %v2440_v36 = vadd.f32 -100.0, %v1033_v56  ;;  %v878_v29 = vmax.f32 %v876_v15, %v877_v45  ;;  %v1525_v42 = vadd.f32 -100.0, %v1193_v23  ;;  %v1037_v57 = vrot.slane %v1036_v25, 4 }
 0x1ab   : > { %v1197_v51 = vrot.slane %v1196_v18, 4  ;;  %v1063_v8 = vmax.f32 %v1061_v31, %v1062_v40  ;;  %v1157_v1 = vadd.f32 %v2275_v50, %v2408_v44  ;;  %v836_v30 = vadd.f32 %v819_v41, %v2408_v44 }
 0x1ac   : > { %v879_v16 = vrot.slane %v878_v29, 2  ;;  %v1210_v35 = vrot.slane %v2382_v59, 1  ;;  %v2446_v48 = vmax.f32 %v898_v28, %v899_v21  ;;  %v1038_v12 = vmax.f32 %v1036_v25, %v1037_v57 }
 0x1ad   : > { %v1198_v39 = vmax.f32 %v1196_v18, %v1197_v51  ;;  %v1064_v10 = vrot.slane %v1063_v8, 4  ;;  %v1222_v22 = vsel %vm837_vm3, %v1157_v1, -inf  ;;  %v902_v9 = vsel %vm837_vm3, %v836_v30, -inf }
 0x1ae   : > { %v880_v37 = vmax.f32 %v878_v29, %v879_v16  ;;  %v1211_v31 = vmax.f32 %v2382_v59, %v1210_v35  ;;  %v1039_v55 = vrot.slane %v1038_v12, 2  ;;  %v1223_v63 = vmax.f32 %v1221_v46, %v1222_v22 }
 0x1af   : > { %v1199_v7 = vrot.slane %v1198_v39, 2  ;;  %v1065_v50 = vmax.f32 %v1063_v8, %v1064_v10  ;;  %v903_v4 = vmax.f32 %v901_v0, %v902_v9  ;;  %v1218_v52 = vmax.f32 %v1216_v61, %v1217_v5 }
 0x1b0   : > { %v881_v44 = vrot.slane %v880_v37, 1  ;;  %v1527_v14 = vadd.f32 -100.0, %v1211_v31  ;;  %v1040_v53 = vmax.f32 %v1038_v12, %v1039_v55  ;;  %v1224_v20 = vrot.slane %v1223_v63, 4 }
 0x1b1   : > { %v1200_v34 = vmax.f32 %v1198_v39, %v1199_v7  ;;  %v1287_v24 = vsel %vm1246_vm4, %v2375_v58, %v2362_v60  ;;  %v904_v59 = vrot.slane %v903_v4, 4  ;;  %v1219_v28 = vrot.slane %v1218_v52, 1 }
 0x1b2   : > { %v882_v15 = vmax.f32 %v880_v37, %v881_v44  ;;  %v1288_v6 = vsel %vm1248_vm5, %v2396_v2, %v1287_v24  ;;  %v1041_v46 = vrot.slane %v1040_v53, 1  ;;  %v1225_v26 = vmax.f32 %v1223_v63, %v1224_v20 }
 0x1b3   : > { %v1201_v27 = vrot.slane %v1200_v34, 1  ;;  %v1289_v61 = vsel %vm1250_vm6, %v1525_v42, %v1288_v6  ;;  %v905_v47 = vmax.f32 %v903_v4, %v904_v59  ;;  %v1220_v56 = vmax.f32 %v1218_v52, %v1219_v28  ;;  %v1311_v4 = vld [vmem:[%s2559_s4 + $0x50] sm:$0xff]  ;;  %v1312_v52 = vld [vmem:[%s2559_s4 + $0x58] sm:$0xff] }
 0x1b4   : > { %v1510_v0 = vadd.f32 -100.0, %v882_v15  ;;  %v1050_v23 = vrot.slane %v2378_v43, 1  ;;  %v1226_v21 = vrot.slane %v1225_v26, 2  ;;  %v1042_v60 = vmax.f32 %v1040_v53, %v1041_v46 }
 0x1b5   : > { %v1202_v45 = vmax.f32 %v1200_v34, %v1201_v27  ;;  %v1058_v58 = vmax.f32 %v2420_v13, %v1057_v49  ;;  %v906_v25 = vrot.slane %v905_v47, 2  ;;  %v1528_v2 = vadd.f32 -100.0, %v1220_v56 }
 0x1b6   : > { %v1051_v18 = vmax.f32 %v2378_v43, %v1050_v23  ;;  %v1066_v40 = vrot.slane %v1065_v50, 2  ;;  %v1227_v41 = vmax.f32 %v1225_v26, %v1226_v21  ;;  %v1518_v42 = vadd.f32 -100.0, %v1042_v60 }
 0x1b7   : > { %v1526_v5 = vadd.f32 -100.0, %v1202_v45  ;;  %v1059_v29 = vrot.slane %v1058_v58, 1  ;;  %v907_v57 = vmax.f32 %v905_v47, %v906_v25  ;;  %v1269_v16 = vsel %vm1246_vm4, %v2368_v33, %v2339_v11  ;;  %v1309_v33 = vld [vmem:[%s2559_s4 + $0x40] sm:$0xff] }
 0x1b8   : > { %v1067_v51 = vmax.f32 %v1065_v50, %v1066_v40  ;;  %v1519_v8 = vadd.f32 -100.0, %v1051_v18  ;;  %v1228_v1 = vrot.slane %v1227_v41, 1  ;;  %v1270_v49 = vsel %vm1248_vm5, %v2387_v17, %v1269_v16  ;;  %v1310_v17 = vld [vmem:[%s2559_s4 + $0x48] sm:$0xff] }
 0x1b9   : > { %v1290_v30 = vsel %vm1252_vm7, %v1526_v5, %v1289_v61  ;;  %v1060_v13 = vmax.f32 %v1058_v58, %v1059_v29  ;;  %v908_v43 = vrot.slane %v907_v57, 1  ;;  %v1271_v39 = vsel %vm1250_vm6, %v2440_v36, %v1270_v49 }
 0x1ba   : > { %v1291_v35 = vsel %vm1254_vm8, %v1527_v14, %v1290_v30  ;;  %v1068_v12 = vrot.slane %v1067_v51, 1  ;;  %v1229_v10 = vmax.f32 %v1227_v41, %v1228_v1  ;;  %v1272_v11 = vsel %vm1252_vm7, %v1518_v42, %v1271_v39 }
 0x1bb   : > { %v1292_v37 = vsel %vm1256_vm9, %v1528_v2, %v1291_v35  ;;  %v1520_v22 = vadd.f32 -100.0, %v1060_v13  ;;  %v1273_v31 = vsel %vm1254_vm8, %v1519_v8, %v1272_v11  ;;  %v909_v55 = vmax.f32 %v907_v57, %v908_v43 }
 0x1bc   : > { %v1069_v9 = vmax.f32 %v1067_v51, %v1068_v12  ;;  %v1247_v36 = vsel %vm1246_vm4, %v2366_v32, %v2337_v38  ;;  %v1511_v7 = vadd.f32 -100.0, %v2417_v19  ;;  %v1529_v50 = vadd.f32 -100.0, %v1229_v10 }
 0x1bd   : > { %v1274_v63 = vsel %vm1256_vm9, %v1520_v22, %v1273_v31  ;;  %v1249_v44 = vsel %vm1248_vm5, %v2385_v62, %v1247_v36  ;;  %v1513_v53 = vadd.f32 -100.0, %v909_v55  ;;  %v1617_v32 = vpack.c.bf16 %v1310_v17, %v1309_v33 }
 0x1be   : > { %v1521_v14 = vadd.f32 -100.0, %v1069_v9  ;;  %v1251_v38 = vsel %vm1250_vm6, %v2438_v54, %v1249_v44  ;;  %v1512_v19 = vadd.f32 -100.0, %v2446_v48  ;;  %v1293_v34 = vsel %vm1258_vm10, %v1529_v50, %v1292_v37 }
 0x1bf   : > { %v1253_v62 = vsel %vm1252_vm7, %v1510_v0, %v1251_v38  ;;  %1294 = vrot.lane.b32.xlu1 %v1293_v34, %s1814_s14  ;;  %1618 = vmatpush3.bf16.msra.mxu1 %v1617_v32  ;;  %v1620_v15 = vpack.c.bf16 %v1312_v52, %v1311_v4  ;;  %v1817_v59 = vmov 0.0   ;;  %s1750_s14 = scalar_lea.vmem %s1749_s13, 256 }
 0x1c0   : > { %v1275_v20 = vsel %vm1258_vm10, %v1521_v14, %v1274_v63  ;;  %v1255_v24 = vsel %vm1254_vm8, %v1511_v7, %v1253_v62  ;;  %1619 = vmatprep.subr.bf16.mxu1 %v1808_v3  ;;  %1574 = vmatprep.mubr.msk.f32.mxu1 %vm1816_vm11, %v1817_v59  ;;  %v1530_v3 = vld [vmem:[%s2560_s5] ss:$0 sm:$0xff]  ;;  %p1752_p1 = scmp.lt.s32.totalorder %s1750_s14, %s1744_s12 }
 0x1c1   : > { %1276 = vrot.lane.b32.xlu0 %v1275_v20, %s1815_s15  ;;  %v1257_v54 = vsel %vm1256_vm9, %v1512_v19, %v1255_v24 }
 0x1c2   : > { %v1259_v48 = vsel %vm1258_vm10, %v1513_v53, %v1257_v54  ;;  %p1753_p2 = por %p1752_p1, %p1751_p0 }
 0x1c3   : > { %1621 = vmatpush3.bf16.msra.mxu1 %v1620_v15 }
 0x1c4   : > { %p1754_p3 = pnand %p1753_p2, %p1747_p13 }
 0x231   : > { %v1295_v28 = vpop.permute.xlu1 %1294 }
 0x233   : > { %v1277_v6 = vpop.permute.xlu0 %1276 }
 0x234   : > { %v1297_v46 = vsel %vm837_vm3, %v1259_v48, %v1277_v6 }
 0x235   : > { %v1299_v27 = vsel %vm1298_vm12, %v1297_v46, %v1295_v28 }
 0x236   : > { %1742 = vtanh.f32 %v1299_v27 }
 0x240   : > { %v1743_v26 = vpop.eup %1742 }
 0x241   : > { %1575 = vmatmul.mubr.msk.f32.vlgmr.msra.gmra.mrb[14].mxu1 %vm473_vm2, %v1743_v26 }
 0x314   : > { %v1389_v61 = vpop.f32.mrb[14].mxu1 }
 0x315   : > { %v1390_v0 = vadd.f32 %v1530_v3, %v1389_v61  ;;  %v1576_v47 = vpop.f32.mrb[15].mxu1 }
 0x317   : > { %1393 = vst [vmem:[%s265_s17] sm:$0xff] %v1390_v0 }
 0x318   : > { %1757 = shalt.err (!%p1754_p3)
}
 0x319   : > { %s1758_s15 = scalar_lea.hbm %s2513_s29, 128  ;;  %s1762_s9 = scalar_lea.hbm %s2561_s6, 256 }
 0x31a   : > { %p1759_p4 = scmp.ne.s32.totalorder %s2513_s29, %s1758_s15  ;;  %p1763_p9 = scmp.lt.u32.totalorder %s2513_s29, %s2561_s6 }
 0x31b   : > { %p1764_p10 = scmp.lt.u32.totalorder %s1762_s9, %s1758_s15  ;;  %p1766_p12 = scmp.lt.u32.totalorder %s1758_s15, %s2513_s29 }
 0x31c   : > { %p1760_p7 = pnand %p1759_p4, %p1892_p5 }
 0x31d   : > { %p1765_p11 = por %p1764_p10, %p1763_p9 }
 0x31e   : > { %p1761_p8 = pneg %p1760_p7 }
 0x31f   : > { %p1767_p13 = por %p1766_p12, %p1765_p11 }
 0x321   : > { %p1768_p0 = pnand %p1767_p13, %p1761_p8 }
 0x323   : > { %1771 = shalt.err (!%p1768_p0)
}
 0x324   : > { %1641 = dma.vmem_to_hbm [thread:$0]  (%p1892_p5), %s2515_s20, 128, %s2513_s29, %s1395_s10  }
 0x325 PF: > { %p1647_p1 = scmp.ge.s32.totalorder %s1806_s24, 2  ;;  %s1420_s17 = sand.u32 1, %s1794_s21  }
 0x326   : > { %s1421_s26 = scalar_lea.sflag [#allocation3], %s1420_s17 }
 0x327   : > { %p1644_p2 = pnand %p1647_p1, %p1896_p6 }
 0x329   : > { %1789 = dma.done.wait (!%p1644_p2), %s1421_s26, 128  }
 0x32a   : > { %1791 = vsyncadd (!%p1644_p2), %s1421_s26, 4294967168  ;;  %p16_p3 = scmp.ge.s32.totalorder %s1879_s27, 4   ;;  %s2564_s21 = smov %s1798_s22 }
 0x32b   : > { %s2565_s22 = smov %s1802_s23  ;;  %s2566_s23 = smov %s1890_s30 }
 0x32c   : > { %s2567_s24 = smov %s1879_s27  ;;  %18 = sbr.rel (!%p16_p3) target bundleno = 3 (0x3), region = 82 }
 0x333   :  { %1426 = vsyncpa [#allocation3], 1 }
 0x334   :  { %1428 = vsyncpa [#allocation3 + $0x1], 1 }

</bundles_post_ra>
